<compile_context>
chip_gen: v5e
topology: v5e:2x2
jax: 0.10.0
libtpu: 0.0.40
codegen_flags: <defaults>
</compile_context>

<pallas_src>
import jax
import jax.numpy as jnp
from jax import lax
from jax.experimental import pallas as pl
from jax.experimental.pallas import tpu as pltpu


def _num_tensorcores() -> int:
    """Best-effort TensorCore count of the local device (1 on v5e/v6e, 2 on v7x)."""
    try:
        dev = jax.devices()[0]
    except Exception:
        return 1
    for attr in ("num_cores", "num_tensorcores", "core_count"):
        n = getattr(dev, attr, None)
        if isinstance(n, int) and 1 <= n <= 16:
            return n
    kind = str(getattr(dev, "device_kind", "")).lower()
    # v7x exposes its two TensorCores behind a single (megacore-style) device.
    if "v7" in kind or "7x" in kind:
        return 2
    return 1


def _sigmoid_mul_kernel(gate_ref, x_ref, o_ref):
    # gate_ref: (Cg // chunk, chunk) — full gate, lane-dense rows of channels.
    # x_ref / o_ref: (tc, hw) feature block for this grid step.
    _, chunk = gate_ref.shape
    tc, _ = x_ref.shape
    n_chunks = tc // chunk
    base = pl.program_id(0) * n_chunks  # first gate row owned by this block

    # chunk x chunk identity mask, built once per grid step.  Used below to move
    # the lane-dense sigmoid row into a per-sublane (chunk, 1) column: a few VPU
    # multiplies + one XLU row-reduce, instead of a lane-padded (C, 1) gate.
    rows = lax.broadcasted_iota(jnp.int32, (chunk, chunk), 0)
    cols = lax.broadcasted_iota(jnp.int32, (chunk, chunk), 1)
    eye = (rows == cols).astype(jnp.float32)

    def body(g, carry):
        # Lane-dense gate row for this channel chunk: (1, chunk).
        g_row = gate_ref[pl.ds(base + g, 1), :]
        s_row = jax.nn.sigmoid(g_row.astype(jnp.float32))       # EUP, lane-dense
        # lane -> sublane relayout via diagonal extraction: (chunk, 1).
        s_col = jnp.sum(s_row * eye, axis=1, keepdims=True)
        r0 = pl.multiple_of(g * chunk, chunk)
        x_blk = x_ref[pl.ds(r0, chunk), :]
        # Multiply in the input dtype (matches PyTorch bf16 behavior; no-op for f32).
        o_ref[pl.ds(r0, chunk), :] = s_col.astype(x_blk.dtype) * x_blk
        return carry

    # fori_loop (not a Python for) bounds vreg live ranges to ~one chunk's worth;
    # unroll=True keeps the short loop fully visible to the LLO scheduler.
    lax.fori_loop(0, n_chunks, body, 0, unroll=True)


def _sigmoid_mul_kernel_fallback(gate_ref, x_ref, o_ref):
    # Simple whole-block kernel for channel counts the chunked path can't tile.
    s = jax.nn.sigmoid(gate_ref[...].astype(jnp.float32))
    o_ref[...] = s.astype(x_ref.dtype) * x_ref[...]


def sigmoid_mul(x_gate, x_feat):
    """x_gate: (N, C, 1, 1), x_feat: (N, C, H, W) -> sigmoid(x_gate) * x_feat."""
    N, C, H, W = x_feat.shape
    assert x_gate.shape == (N, C, 1, 1)

    hw = H * W
    cg = N * C                      # fold batch into channels (gate is per (n, c))
    feat2d = x_feat.reshape(cg, hw)

    # Generation-dependent grid: split channels across TensorCores only when the
    # chip actually has two (v7x).  On 1-TC v5e/v6e a second grid step is pure
    # loop overhead.
    ncores = _num_tensorcores()
    nblk = 2 if (ncores >= 2 and cg % 2 == 0 and (cg // 2) % 8 == 0) else 1
    tc = cg // nblk

    # Largest channel-chunk (<= one vreg of lanes) that divides the per-step rows.
    chunk = next((c for c in (128, 64, 32, 16, 8) if tc % c == 0), None)

    if chunk is None:
        # Odd channel counts: single whole-array block with a (cg, 1) gate column.
        gate2d = x_gate.reshape(cg, 1)
        out2d = pl.pallas_call(
            _sigmoid_mul_kernel_fallback,
            out_shape=jax.ShapeDtypeStruct((cg, hw), x_feat.dtype),
            grid=(1,),
            in_specs=[
                pl.BlockSpec((cg, 1), lambda i: (0, 0)),
                pl.BlockSpec((cg, hw), lambda i: (0, 0)),
            ],
            out_specs=pl.BlockSpec((cg, hw), lambda i: (0, 0)),
        )(gate2d, feat2d)
        return out2d.reshape(N, C, H, W)

    # Lane-dense gate rows: free metadata reshape, contiguous HBM->VMEM DMA.
    gate_rows = x_gate.reshape(cg // chunk, chunk)

    out2d = pl.pallas_call(
        _sigmoid_mul_kernel,
        out_shape=jax.ShapeDtypeStruct((cg, hw), x_feat.dtype),
        grid=(nblk,),
        in_specs=[
            # Full (tiny) gate every step; block == full dims so always legal.
            pl.BlockSpec((cg // chunk, chunk), lambda i: (0, 0)),
            pl.BlockSpec((tc, hw), lambda i: (i, 0)),
        ],
        out_specs=pl.BlockSpec((tc, hw), lambda i: (i, 0)),
        compiler_params=pltpu.CompilerParams(
            dimension_semantics=("parallel",),
        ),
    )(gate_rows, feat2d)

    return out2d.reshape(N, C, H, W)


def reference(x_gate, x_feat):
    return jax.nn.sigmoid(x_gate) * x_feat


if __name__ == "__main__":
    key = jax.random.PRNGKey(0)
    k1, k2 = jax.random.split(key)

    # Shapes implied by the module's forward.
    x156 = jax.random.normal(k1, (1, 640, 1, 1), dtype=jnp.float32)    # gate
    x152 = jax.random.normal(k2, (1, 640, 14, 14), dtype=jnp.float32)  # features

    out = jax.block_until_ready(sigmoid_mul(x156, x152))

    ref = reference(x156, x152)
    assert out.shape == (1, 640, 14, 14)
    assert jnp.allclose(out, ref, atol=1e-5, rtol=1e-5), "mismatch vs reference"

    print("KERNEL_OK")
</pallas_src>

<mosaic_0001>
module attributes {stable_mosaic.version = 11 : i64} {
  func.func @_sigmoid_mul_kernel(%arg0: i32, %arg1: memref<5x128xf32, #tpu.memory_space<vmem>>, %arg2: memref<640x196xf32, #tpu.memory_space<vmem>>, %arg3: memref<640x196xf32, #tpu.memory_space<vmem>>) attributes {dimension_semantics = [#tpu.dimension_semantics<parallel>], iteration_bounds = array<i64: 1>, scalar_prefetch = 0 : i64, scratch_operands = 0 : i64, tpu.core_type = #tpu.core_type<tc>, window_params = [{pipeline_mode = #tpu.pipeline_mode<synchronous>, transform_indices = @transform_0, window_bounds = array<i64: 5, 128>}, {transform_indices = @transform_1, window_bounds = array<i64: 640, 196>}, {transform_indices = @transform_2, window_bounds = array<i64: 640, 196>}]} {
    %c5_i32 = arith.constant 5 : i32
    %0 = arith.muli %arg0, %c5_i32 : i32
    %1 = tpu.iota {dimensions = array<i32: 0>} : vector<128x128xi32>
    %2 = tpu.iota {dimensions = array<i32: 1>} : vector<128x128xi32>
    %3 = arith.cmpi eq, %1, %2 : vector<128x128xi32>
    %4 = arith.extui %3 : vector<128x128xi1> to vector<128x128xi32>
    %5 = arith.sitofp %4 : vector<128x128xi32> to vector<128x128xf32>
    %c0_i32 = arith.constant 0 : i32
    %6 = arith.addi %0, %c0_i32 : i32
    %7 = arith.index_cast %6 : i32 to index
    %c0 = arith.constant 0 : index
    %8 = vector.load %arg1[%7, %c0] : memref<5x128xf32, #tpu.memory_space<vmem>>, vector<1x128xf32>
    %9 = arith.negf %8 : vector<1x128xf32>
    %10 = math.exp %9 : vector<1x128xf32>
    %cst = arith.constant 1.000000e+00 : f32
    %11 = vector.broadcast %cst : f32 to vector<1x128xf32>
    %12 = arith.addf %11, %10 : vector<1x128xf32>
    %13 = arith.divf %11, %12 : vector<1x128xf32>
    %14 = vector.broadcast %13 : vector<1x128xf32> to vector<128x128xf32>
    %15 = arith.mulf %14, %5 : vector<128x128xf32>
    %cst_0 = arith.constant dense<0.000000e+00> : vector<128xf32>
    %16 = vector.multi_reduction <add>, %15, %cst_0 [1] : vector<128x128xf32> to vector<128xf32>
    %17 = vector.shape_cast %16 : vector<128xf32> to vector<128x1xf32>
    %c128_i32 = arith.constant 128 : i32
    %18 = arith.muli %c0_i32, %c128_i32 : i32
    %19 = tpu.assume_multiple %18, 128 : i32
    %20 = arith.index_cast %19 : i32 to index
    %c0_1 = arith.constant 0 : index
    %21 = vector.load %arg2[%20, %c0_1] : memref<640x196xf32, #tpu.memory_space<vmem>>, vector<128x196xf32>
    %22 = vector.broadcast %17 : vector<128x1xf32> to vector<128x196xf32>
    %23 = arith.mulf %22, %21 : vector<128x196xf32>
    %24 = arith.index_cast %19 : i32 to index
    %c0_2 = arith.constant 0 : index
    %25 = vector.load %arg3[%24, %c0_2] : memref<640x196xf32, #tpu.memory_space<vmem>>, vector<128x196xf32>
    tpu.vector_store %arg3[%24, %c0_2], %23 {strides = array<i32>} : memref<640x196xf32, #tpu.memory_space<vmem>>, vector<128x196xf32>,
    %c1_i32 = arith.constant 1 : i32
    %26 = arith.addi %0, %c1_i32 : i32
    %27 = arith.index_cast %26 : i32 to index
    %c0_3 = arith.constant 0 : index
    %28 = vector.load %arg1[%27, %c0_3] : memref<5x128xf32, #tpu.memory_space<vmem>>, vector<1x128xf32>
    %29 = arith.negf %28 : vector<1x128xf32>
    %30 = math.exp %29 : vector<1x128xf32>
    %cst_4 = arith.constant 1.000000e+00 : f32
    %31 = vector.broadcast %cst_4 : f32 to vector<1x128xf32>
    %32 = arith.addf %31, %30 : vector<1x128xf32>
    %33 = arith.divf %31, %32 : vector<1x128xf32>
    %34 = vector.broadcast %33 : vector<1x128xf32> to vector<128x128xf32>
    %35 = arith.mulf %34, %5 : vector<128x128xf32>
    %cst_5 = arith.constant dense<0.000000e+00> : vector<128xf32>
    %36 = vector.multi_reduction <add>, %35, %cst_5 [1] : vector<128x128xf32> to vector<128xf32>
    %37 = vector.shape_cast %36 : vector<128xf32> to vector<128x1xf32>
    %c128_i32_6 = arith.constant 128 : i32
    %38 = arith.muli %c1_i32, %c128_i32_6 : i32
    %39 = tpu.assume_multiple %38, 128 : i32
    %40 = arith.index_cast %39 : i32 to index
    %c0_7 = arith.constant 0 : index
    %41 = vector.load %arg2[%40, %c0_7] : memref<640x196xf32, #tpu.memory_space<vmem>>, vector<128x196xf32>
    %42 = vector.broadcast %37 : vector<128x1xf32> to vector<128x196xf32>
    %43 = arith.mulf %42, %41 : vector<128x196xf32>
    %44 = arith.index_cast %39 : i32 to index
    %c0_8 = arith.constant 0 : index
    %45 = vector.load %arg3[%44, %c0_8] : memref<640x196xf32, #tpu.memory_space<vmem>>, vector<128x196xf32>
    tpu.vector_store %arg3[%44, %c0_8], %43 {strides = array<i32>} : memref<640x196xf32, #tpu.memory_space<vmem>>, vector<128x196xf32>,
    %c2_i32 = arith.constant 2 : i32
    %46 = arith.addi %0, %c2_i32 : i32
    %47 = arith.index_cast %46 : i32 to index
    %c0_9 = arith.constant 0 : index
    %48 = vector.load %arg1[%47, %c0_9] : memref<5x128xf32, #tpu.memory_space<vmem>>, vector<1x128xf32>
    %49 = arith.negf %48 : vector<1x128xf32>
    %50 = math.exp %49 : vector<1x128xf32>
    %cst_10 = arith.constant 1.000000e+00 : f32
    %51 = vector.broadcast %cst_10 : f32 to vector<1x128xf32>
    %52 = arith.addf %51, %50 : vector<1x128xf32>
    %53 = arith.divf %51, %52 : vector<1x128xf32>
    %54 = vector.broadcast %53 : vector<1x128xf32> to vector<128x128xf32>
    %55 = arith.mulf %54, %5 : vector<128x128xf32>
    %cst_11 = arith.constant dense<0.000000e+00> : vector<128xf32>
    %56 = vector.multi_reduction <add>, %55, %cst_11 [1] : vector<128x128xf32> to vector<128xf32>
    %57 = vector.shape_cast %56 : vector<128xf32> to vector<128x1xf32>
    %c128_i32_12 = arith.constant 128 : i32
    %58 = arith.muli %c2_i32, %c128_i32_12 : i32
    %59 = tpu.assume_multiple %58, 128 : i32
    %60 = arith.index_cast %59 : i32 to index
    %c0_13 = arith.constant 0 : index
    %61 = vector.load %arg2[%60, %c0_13] : memref<640x196xf32, #tpu.memory_space<vmem>>, vector<128x196xf32>
    %62 = vector.broadcast %57 : vector<128x1xf32> to vector<128x196xf32>
    %63 = arith.mulf %62, %61 : vector<128x196xf32>
    %64 = arith.index_cast %59 : i32 to index
    %c0_14 = arith.constant 0 : index
    %65 = vector.load %arg3[%64, %c0_14] : memref<640x196xf32, #tpu.memory_space<vmem>>, vector<128x196xf32>
    tpu.vector_store %arg3[%64, %c0_14], %63 {strides = array<i32>} : memref<640x196xf32, #tpu.memory_space<vmem>>, vector<128x196xf32>,
    %c3_i32 = arith.constant 3 : i32
    %66 = arith.addi %0, %c3_i32 : i32
    %67 = arith.index_cast %66 : i32 to index
    %c0_15 = arith.constant 0 : index
    %68 = vector.load %arg1[%67, %c0_15] : memref<5x128xf32, #tpu.memory_space<vmem>>, vector<1x128xf32>
    %69 = arith.negf %68 : vector<1x128xf32>
    %70 = math.exp %69 : vector<1x128xf32>
    %cst_16 = arith.constant 1.000000e+00 : f32
    %71 = vector.broadcast %cst_16 : f32 to vector<1x128xf32>
    %72 = arith.addf %71, %70 : vector<1x128xf32>
    %73 = arith.divf %71, %72 : vector<1x128xf32>
    %74 = vector.broadcast %73 : vector<1x128xf32> to vector<128x128xf32>
    %75 = arith.mulf %74, %5 : vector<128x128xf32>
    %cst_17 = arith.constant dense<0.000000e+00> : vector<128xf32>
    %76 = vector.multi_reduction <add>, %75, %cst_17 [1] : vector<128x128xf32> to vector<128xf32>
    %77 = vector.shape_cast %76 : vector<128xf32> to vector<128x1xf32>
    %c128_i32_18 = arith.constant 128 : i32
    %78 = arith.muli %c3_i32, %c128_i32_18 : i32
    %79 = tpu.assume_multiple %78, 128 : i32
    %80 = arith.index_cast %79 : i32 to index
    %c0_19 = arith.constant 0 : index
    %81 = vector.load %arg2[%80, %c0_19] : memref<640x196xf32, #tpu.memory_space<vmem>>, vector<128x196xf32>
    %82 = vector.broadcast %77 : vector<128x1xf32> to vector<128x196xf32>
    %83 = arith.mulf %82, %81 : vector<128x196xf32>
    %84 = arith.index_cast %79 : i32 to index
    %c0_20 = arith.constant 0 : index
    %85 = vector.load %arg3[%84, %c0_20] : memref<640x196xf32, #tpu.memory_space<vmem>>, vector<128x196xf32>
    tpu.vector_store %arg3[%84, %c0_20], %83 {strides = array<i32>} : memref<640x196xf32, #tpu.memory_space<vmem>>, vector<128x196xf32>,
    %c4_i32 = arith.constant 4 : i32
    %86 = arith.addi %0, %c4_i32 : i32
    %87 = arith.index_cast %86 : i32 to index
    %c0_21 = arith.constant 0 : index
    %88 = vector.load %arg1[%87, %c0_21] : memref<5x128xf32, #tpu.memory_space<vmem>>, vector<1x128xf32>
    %89 = arith.negf %88 : vector<1x128xf32>
    %90 = math.exp %89 : vector<1x128xf32>
    %cst_22 = arith.constant 1.000000e+00 : f32
    %91 = vector.broadcast %cst_22 : f32 to vector<1x128xf32>
    %92 = arith.addf %91, %90 : vector<1x128xf32>
    %93 = arith.divf %91, %92 : vector<1x128xf32>
    %94 = vector.broadcast %93 : vector<1x128xf32> to vector<128x128xf32>
    %95 = arith.mulf %94, %5 : vector<128x128xf32>
    %cst_23 = arith.constant dense<0.000000e+00> : vector<128xf32>
    %96 = vector.multi_reduction <add>, %95, %cst_23 [1] : vector<128x128xf32> to vector<128xf32>
    %97 = vector.shape_cast %96 : vector<128xf32> to vector<128x1xf32>
    %c128_i32_24 = arith.constant 128 : i32
    %98 = arith.muli %c4_i32, %c128_i32_24 : i32
    %99 = tpu.assume_multiple %98, 128 : i32
    %100 = arith.index_cast %99 : i32 to index
    %c0_25 = arith.constant 0 : index
    %101 = vector.load %arg2[%100, %c0_25] : memref<640x196xf32, #tpu.memory_space<vmem>>, vector<128x196xf32>
    %102 = vector.broadcast %97 : vector<128x1xf32> to vector<128x196xf32>
    %103 = arith.mulf %102, %101 : vector<128x196xf32>
    %104 = arith.index_cast %99 : i32 to index
    %c0_26 = arith.constant 0 : index
    %105 = vector.load %arg3[%104, %c0_26] : memref<640x196xf32, #tpu.memory_space<vmem>>, vector<128x196xf32>
    tpu.vector_store %arg3[%104, %c0_26], %103 {strides = array<i32>} : memref<640x196xf32, #tpu.memory_space<vmem>>, vector<128x196xf32>,
    %c5_i32_27 = arith.constant 5 : i32
    return
  }
  func.func @transform_0(%arg0: i32) -> (i32, i32) {
    %c0_i32 = arith.constant 0 : i32
    %c0_i32_0 = arith.constant 0 : i32
    %c0_i32_1 = arith.constant 0 : i32
    return %c0_i32, %c0_i32_0 : i32, i32
  }
  func.func @transform_1(%arg0: i32) -> (i32, i32) {
    %c0_i32 = arith.constant 0 : i32
    %c0_i32_0 = arith.constant 0 : i32
    return %arg0, %c0_i32 : i32, i32
  }
  func.func @transform_2(%arg0: i32) -> (i32, i32) {
    %c0_i32 = arith.constant 0 : i32
    %c0_i32_0 = arith.constant 0 : i32
    return %arg0, %c0_i32 : i32, i32
  }
}

</mosaic_0001>

<bundles_post_ra>
// kernel: tpu_custom_call.1
= control target key start
LH: loop header
LB: loop body
LE: loop exit
PB: predicated region body
PF: predicated region fallthrough
CT: control target
= control target key end

     0   :  { %v12_v4 = vlaneseq  ;;  %v1257_v22 = vmov 0.0   ;;  %s2605_s0 = inlined_call_operand.vmem [shape: f32[5,128], index: 0, kind: input, shape index: {}]   ;;  %s2606_s1 = inlined_call_operand.vmem [shape: f32[640,196], index: 1, kind: input, shape index: {}]   ;;  %s2607_s2 = inlined_call_operand.vmem [shape: f32[640,196], index: 2, kind: output, shape index: {}]  }
   0x1   :  { %v80_v0 = vld [vmem:[%s2605_s0] sm:$0x1]  ;;  %v972_v5 = vld [vmem:[%s2605_s0 + $0x1] sm:$0x1] }
   0x2   :  { %v971_v1 = vmul.f32 -1.442695, %v80_v0  ;;  %v1279_v6 = vshrl.u32 %v12_v4, 7  ;;  %v973_v7 = vmul.f32 -1.442695, %v972_v5  ;;  %v1281_v9 = vand.u32 127, %v12_v4 }
   0x3   :  { %v1038_v5 = vld [vmem:[%s2605_s0 + $0x2] sm:$0x1] }
   0x4   :  { %1237 = vpow2.f32 %v971_v1  ;;  %v15_v11 = vadd.s32 16, %v1279_v6  ;;  %v17_v13 = vadd.s32 32, %v1279_v6  ;;  %vm31_vm3 = vcmp.eq.s32.totalorder %v1279_v6, %v1281_v9 }
   0x5   :  { %v16_v20 = vadd.s32 24, %v1279_v6  ;;  %v1291_v23 = vsel %vm31_vm3, 1.0, %v1257_v22  ;;  %v14_v24 = vadd.s32 8, %v1279_v6  ;;  %v18_v28 = vadd.s32 40, %v1279_v6 }
   0x6   :  { %vm33_vm4 = vcmp.eq.s32.totalorder %v15_v11, %v1281_v9  ;;  %vm35_vm6 = vcmp.eq.s32.totalorder %v17_v13, %v1281_v9  ;;  %v20_v37 = vadd.s32 56, %v1279_v6  ;;  %v19_v38 = vadd.s32 48, %v1279_v6 }
   0x7   :  { %v1295_v25 = vsel %vm33_vm4, 1.0, %v1257_v22  ;;  %v1298_v27 = vsel %vm35_vm6, 1.0, %v1257_v22  ;;  %vm34_vm7 = vcmp.eq.s32.totalorder %v16_v20, %v1281_v9  ;;  %vm32_vm8 = vcmp.eq.s32.totalorder %v14_v24, %v1281_v9 }
   0x8   :  { %vm36_vm9 = vcmp.eq.s32.totalorder %v18_v28, %v1281_v9  ;;  %v1315_v34 = vsel %vm34_vm7, 1.0, %v1257_v22  ;;  %v1318_v35 = vsel %vm32_vm8, 1.0, %v1257_v22  ;;  %v21_v39 = vadd.s32 64, %v1279_v6 }
   0x9   :  { %v1322_v36 = vsel %vm36_vm9, 1.0, %v1257_v22  ;;  %vm38_vm10 = vcmp.eq.s32.totalorder %v20_v37, %v1281_v9  ;;  %vm37_vm11 = vcmp.eq.s32.totalorder %v19_v38, %v1281_v9  ;;  %v23_v47 = vadd.s32 80, %v1279_v6 }
   0xa   :  { %v1238_v2 = vpop.eup %1237  ;;  %vm39_vm12 = vcmp.eq.s32.totalorder %v21_v39, %v1281_v9  ;;  %v1337_v44 = vsel %vm38_vm10, 1.0, %v1257_v22  ;;  %v1340_v45 = vsel %vm37_vm11, 1.0, %v1257_v22  ;;  %v22_v48 = vadd.s32 72, %v1279_v6 }
   0xb   :  { %v84_v3 = vadd.f32 1.0, %v1238_v2  ;;  %v1343_v46 = vsel %vm39_vm12, 1.0, %v1257_v22  ;;  %v24_v50 = vadd.s32 88, %v1279_v6  ;;  %vm41_vm13 = vcmp.eq.s32.totalorder %v23_v47, %v1281_v9 }
   0xc   :  { %vm40_vm14 = vcmp.eq.s32.totalorder %v22_v48, %v1281_v9  ;;  %v1359_v55 = vsel %vm41_vm13, 1.0, %v1257_v22  ;;  %v26_v58 = vadd.s32 104, %v1279_v6  ;;  %v25_v59 = vadd.s32 96, %v1279_v6 }
   0xd   :  { %1239 = vrcp.f32 %v84_v3  ;;  %v96_v12 = vand.u32 2147483648, %v84_v3  ;;  %vm90_vm0 = vweird.f32 %v84_v3  ;;  %v94_v15 = vand.u32 2147483647, %v84_v3 }
   0xe   :  { %1241 = vpow2.f32 %v973_v7  ;;  %vm42_vm15 = vcmp.eq.s32.totalorder %v24_v50, %v1281_v9  ;;  %v1362_v56 = vsel %vm40_vm14, 1.0, %v1257_v22  ;;  %v27_v61 = vadd.s32 112, %v1279_v6 }
   0xf   :  { %v97_v17 = vor.u32 1.1754944e-38, %v96_v12  ;;  %vm95_vm5 = vcmp.eq.f32.partialorder %v94_v15, 8.507059e+37  ;;  %v1365_v57 = vsel %vm42_vm15, 1.0, %v1257_v22  ;;  %vm43_vm3 = vcmp.eq.s32.totalorder %v25_v59, %v1281_v9 }
  0x10   :  { %vm45_vm4 = vcmp.eq.s32.totalorder %v27_v61, %v1281_v9  ;;  %v1039_v11 = vmul.f32 -1.442695, %v1038_v5 }
  0x11   :  { %v1396_v12 = vsel %vm45_vm4, 1.0, %v1257_v22 }
  0x13   :  { %v1240_v8 = vpop.eup %1239 }
  0x14   :  { %v86_v10 = vmul.f32 %v1240_v8, %v84_v3  ;;  %vm91_vm1 = vweird.f32 %v1240_v8  ;;  %v1242_v19 = vpop.eup %1241 }
  0x15   :  { %vm92_vm2 = vmor %vm90_vm0, %vm91_vm1  ;;  %v1304_v30 = vadd.f32 1.0, %v1242_v19 }
  0x16   :  { %v87_v14 = vsub.f32 1.0, %v86_v10 }
  0x17   :  { %1243 = vrcp.f32 %v1304_v30  ;;  %vm263_vm0 = vweird.f32 %v1304_v30  ;;  %v269_v1 = vand.u32 2147483648, %v1304_v30  ;;  %v267_v3 = vand.u32 2147483647, %v1304_v30 }
  0x18   :  { %v88_v16 = vmul.f32 %v1240_v8, %v87_v14  ;;  %v28_v14 = vadd.s32 120, %v1279_v6  ;;  %1245 = vpow2.f32 %v1039_v11 }
  0x19   :  { %v270_v10 = vor.u32 1.1754944e-38, %v269_v1  ;;  %vm268_vm6 = vcmp.eq.f32.partialorder %v267_v3, 8.507059e+37 }
  0x1a   :  { %v89_v18 = vadd.f32 %v1240_v8, %v88_v16  ;;  %vm46_vm7 = vcmp.eq.s32.totalorder %v28_v14, %v1281_v9 }
  0x1b   :  { %v1409_v20 = vsel %vm46_vm7, 1.0, %v1257_v22 }
  0x1c   :  { %v93_v21 = vsel %vm92_vm2, %v1240_v8, %v89_v18  ;;  %vm44_vm2 = vcmp.eq.s32.totalorder %v26_v58, %v1281_v9  ;;  %v1393_v8 = vsel %vm43_vm3, 1.0, %v1257_v22 }
  0x1d   :  { %v98_v26 = vsel %vm95_vm5, %v97_v17, %v93_v21  ;;  %v1244_v43 = vpop.eup %1243  ;;  %v1390_v7 = vsel %vm44_vm2, 1.0, %v1257_v22 }
  0x1e   :  { %v1301_v29 = vperm.slane %v98_v26, 0  ;;  %v259_v49 = vmul.f32 %v1244_v43, %v1304_v30  ;;  %vm264_vm1 = vweird.f32 %v1244_v43  ;;  %v1246_v6 = vpop.eup %1245 }
  0x1f   :  { %vm1382_vm5 = vmor %vm263_vm0, %vm264_vm1  ;;  %v429_v28 = vadd.f32 1.0, %v1246_v6  ;;  %vm219_vm0 = vcmask 556032  }
  0x20   :  { %v103_v31 = vmul.f32 %v1295_v25, %v1301_v29  ;;  %v101_v32 = vmul.f32 %v1291_v23, %v1301_v29  ;;  %v105_v33 = vmul.f32 %v1298_v27, %v1301_v29  ;;  %v104_v40 = vmul.f32 %v1315_v34, %v1301_v29 }
  0x21   :  { %v102_v41 = vmul.f32 %v1318_v35, %v1301_v29  ;;  %v106_v42 = vmul.f32 %v1322_v36, %v1301_v29  ;;  %v108_v51 = vmul.f32 %v1337_v44, %v1301_v29  ;;  %v107_v52 = vmul.f32 %v1340_v45, %v1301_v29 }
  0x22   :  { %121 = vadd.xlane.f32.xlu1 %v103_v31  ;;  %117 = vadd.xlane.f32.xlu0 %v101_v32  ;;  %v109_v53 = vmul.f32 %v1343_v46, %v1301_v29  ;;  %v260_v54 = vsub.f32 1.0, %v259_v49  ;;  %v111_v62 = vmul.f32 %v1359_v55, %v1301_v29  ;;  %v110_v63 = vmul.f32 %v1362_v56, %v1301_v29 }
  0x23   :  { %125 = vadd.xlane.f32.xlu2 %v105_v33  ;;  %v112_v0 = vmul.f32 %v1365_v57, %v1301_v29  ;;  %v114_v15 = vmul.f32 %v1390_v7, %v1301_v29  ;;  %v113_v16 = vmul.f32 %v1393_v8, %v1301_v29  ;;  %v115_v17 = vmul.f32 %v1396_v12, %v1301_v29 }
  0x24   :  { %v261_v60 = vmul.f32 %v1244_v43, %v260_v54  ;;  %v116_v24 = vmul.f32 %v1409_v20, %v1301_v29  ;;  %1247 = vrcp.f32 %v429_v28  ;;  %vm435_vm8 = vweird.f32 %v429_v28 }
  0x25   :  { %v439_v48 = vand.u32 2147483647, %v429_v28 }
  0x26   :  { %v262_v2 = vadd.f32 %v1244_v43, %v261_v60 }
  0x27   :  { %vm440_vm11 = vcmp.eq.f32.partialorder %v439_v48, 8.507059e+37 }
  0x28   :  { %v266_v13 = vsel %vm1382_vm5, %v1244_v43, %v262_v2  ;;  %v441_v43 = vand.u32 2147483648, %v429_v28 }
  0x29   :  { %v271_v18 = vsel %vm268_vm6, %v270_v10, %v266_v13 }
  0x2a   :  { %123 = vadd.xlane.f32.xlu1 %v104_v40  ;;  %119 = vadd.xlane.f32.xlu0 %v102_v41  ;;  %v273_v19 = vperm.slane %v271_v18, 0  ;;  %v1248_v31 = vpop.eup %1247  ;;  %v442_v49 = vor.u32 1.1754944e-38, %v441_v43 }
  0x2b   :  { %127 = vadd.xlane.f32.xlu2 %v106_v42  ;;  %v431_v32 = vmul.f32 %v1248_v31, %v429_v28  ;;  %vm436_vm9 = vweird.f32 %v1248_v31 }
  0x2c   :  { %v274_v21 = vmul.f32 %v1291_v23, %v273_v19  ;;  %v275_v26 = vmul.f32 %v1318_v35, %v273_v19  ;;  %v277_v9 = vmul.f32 %v1315_v34, %v273_v19  ;;  %v276_v30 = vmul.f32 %v1295_v25, %v273_v19  ;;  %vm437_vm10 = vmor %vm435_vm8, %vm436_vm9 }
  0x2d   :  { %v278_v22 = vmul.f32 %v1298_v27, %v273_v19  ;;  %v280_v29 = vmul.f32 %v1340_v45, %v273_v19  ;;  %v279_v33 = vmul.f32 %v1322_v36, %v273_v19  ;;  %v281_v37 = vmul.f32 %v1337_v44, %v273_v19 }
  0x2e   :  { %v432_v38 = vsub.f32 1.0, %v431_v32  ;;  %v283_v40 = vmul.f32 %v1362_v56, %v273_v19  ;;  %v282_v41 = vmul.f32 %v1343_v46, %v273_v19  ;;  %v284_v42 = vmul.f32 %v1359_v55, %v273_v19 }
  0x2f   :  { %v287_v54 = vmul.f32 %v1390_v7, %v273_v19  ;;  %v289_v61 = vmul.f32 %v1409_v20, %v273_v19 }
  0x30   :  { %v433_v39 = vmul.f32 %v1248_v31, %v432_v38  ;;  %v152_v38 = vld [vmem:[%s2606_s1] sm:$0xff] }
  0x32   :  { %131 = vadd.xlane.f32.xlu1 %v108_v51  ;;  %129 = vadd.xlane.f32.xlu0 %v107_v52  ;;  %v434_v47 = vadd.f32 %v1248_v31, %v433_v39  ;;  %v1104_v51 = vld [vmem:[%s2605_s0 + $0x3] sm:$0x1]  ;;  %v286_v52 = vmul.f32 %v1393_v8, %v273_v19  ;;  %v153_v39 = vld [vmem:[%s2606_s1 + $0x8] sm:$0xff] }
  0x33   :  { %133 = vadd.xlane.f32.xlu2 %v109_v53  ;;  %v285_v53 = vmul.f32 %v1365_v57, %v273_v19  ;;  %v1105_v59 = vmul.f32 -1.442695, %v1104_v51 }
  0x34   :  { %v438_v50 = vsel %vm437_vm10, %v1248_v31, %v434_v47  ;;  %v160_v47 = vld [vmem:[%s2606_s1 + $0x40] sm:$0xff] }
  0x35   :  { %v443_v58 = vsel %vm440_vm11, %v442_v49, %v438_v50  ;;  %1249 = vpow2.f32 %v1105_v59 }
  0x36   :  { %v1430_v60 = vperm.slane %v443_v58, 0 }
  0x38   :  { %v448_v2 = vmul.f32 %v1295_v25, %v1430_v60  ;;  %v447_v3 = vmul.f32 %v1318_v35, %v1430_v60  ;;  %v449_v4 = vmul.f32 %v1315_v34, %v1430_v60  ;;  %v451_v5 = vmul.f32 %v1322_v36, %v1430_v60 }
  0x39   :  { %v450_v10 = vmul.f32 %v1298_v27, %v1430_v60  ;;  %v452_v13 = vmul.f32 %v1340_v45, %v1430_v60  ;;  %v455_v18 = vmul.f32 %v1362_v56, %v1430_v60  ;;  %v459_v43 = vmul.f32 %v1390_v7, %v1430_v60 }
  0x3a   :  { %137 = vadd.xlane.f32.xlu1 %v111_v62  ;;  %135 = vadd.xlane.f32.xlu0 %v110_v63  ;;  %v288_v62 = vmul.f32 %v1396_v12, %v273_v19  ;;  %v446_v63 = vmul.f32 %v1291_v23, %v1430_v60  ;;  %v461_v58 = vmul.f32 %v1409_v20, %v1430_v60 }
  0x3b   :  { %139 = vadd.xlane.f32.xlu2 %v112_v0  ;;  %v1250_v0 = vpop.eup %1249 }
  0x3c   :  { %v601_v1 = vadd.f32 1.0, %v1250_v0  ;;  %v154_v0 = vld [vmem:[%s2606_s1 + $0x10] sm:$0xff] }
  0x3e   :  { %1251 = vrcp.f32 %v601_v1  ;;  %vm607_vm12 = vweird.f32 %v601_v1  ;;  %v613_v6 = vand.u32 2147483648, %v601_v1  ;;  %v611_v28 = vand.u32 2147483647, %v601_v1 }
  0x40   :  { %v614_v31 = vor.u32 1.1754944e-38, %v613_v6  ;;  %vm612_vm15 = vcmp.eq.f32.partialorder %v611_v28, 8.507059e+37  ;;  %v167_v28 = vld [vmem:[%s2606_s1 + $0x78] sm:$0xff] }
  0x42   :  { %143 = vadd.xlane.f32.xlu1 %v114_v15  ;;  %141 = vadd.xlane.f32.xlu0 %v113_v16  ;;  %v454_v15 = vmul.f32 %v1343_v46, %v1430_v60  ;;  %v453_v16 = vmul.f32 %v1337_v44, %v1430_v60 }
  0x43   :  { %145 = vadd.xlane.f32.xlu2 %v115_v17 }
  0x44   :  { %v1252_v11 = vpop.eup %1251 }
  0x45   :  { %v603_v14 = vmul.f32 %v1252_v11, %v601_v1  ;;  %vm608_vm13 = vweird.f32 %v1252_v11 }
  0x46   :  { %vm1460_vm14 = vmor %vm607_vm12, %vm608_vm13 }
  0x47   :  { %v604_v17 = vsub.f32 1.0, %v603_v14 }
  0x49   :  { %v605_v19 = vmul.f32 %v1252_v11, %v604_v17 }
  0x4a   :  { %290 = vadd.xlane.f32.xlu1 %v274_v21  ;;  %147 = vadd.xlane.f32.xlu0 %v116_v24  ;;  %v457_v21 = vmul.f32 %v1365_v57, %v1430_v60  ;;  %v456_v24 = vmul.f32 %v1359_v55, %v1430_v60 }
  0x4b   :  { %292 = vadd.xlane.f32.xlu2 %v275_v26  ;;  %v606_v26 = vadd.f32 %v1252_v11, %v605_v19 }
  0x4d   :  { %v610_v32 = vsel %vm1460_vm14, %v1252_v11, %v606_v26  ;;  %v166_v26 = vld [vmem:[%s2606_s1 + $0x70] sm:$0xff] }
  0x4e   :  { %v615_v48 = vsel %vm612_vm15, %v614_v31, %v610_v32 }
  0x52   :  { %296 = vadd.xlane.f32.xlu1 %v277_v9  ;;  %294 = vadd.xlane.f32.xlu0 %v276_v30  ;;  %v458_v9 = vmul.f32 %v1393_v8, %v1430_v60  ;;  %v165_v30 = vld [vmem:[%s2606_s1 + $0x68] sm:$0xff] }
  0x53   :  { %298 = vadd.xlane.f32.xlu2 %v278_v22  ;;  %v1170_v22 = vld [vmem:[%s2605_s0 + $0x4] sm:$0x1] }
  0x5a   :  { %302 = vadd.xlane.f32.xlu1 %v280_v29  ;;  %300 = vadd.xlane.f32.xlu0 %v279_v33  ;;  %v1171_v29 = vmul.f32 -1.442695, %v1170_v22  ;;  %v156_v33 = vld [vmem:[%s2606_s1 + $0x20] sm:$0xff] }
  0x5b   :  { %304 = vadd.xlane.f32.xlu2 %v281_v37  ;;  %v157_v37 = vld [vmem:[%s2606_s1 + $0x28] sm:$0xff] }
  0x5c   :  { %1253 = vpow2.f32 %v1171_v29  ;;  %v168_v29 = vld [vmem:[%s2606_s1 + $0x80] sm:$0xff] }
  0x62   :  { %308 = vadd.xlane.f32.xlu1 %v283_v40  ;;  %306 = vadd.xlane.f32.xlu0 %v282_v41  ;;  %v1254_v1 = vpop.eup %1253 }
  0x63   :  { %310 = vadd.xlane.f32.xlu2 %v284_v42  ;;  %v460_v42 = vmul.f32 %v1396_v12, %v1430_v60  ;;  %v158_v60 = vld [vmem:[%s2606_s1 + $0x30] sm:$0xff]  ;;  %v1540_v6 = vadd.f32 1.0, %v1254_v1 }
  0x65   :  { %1255 = vrcp.f32 %v1540_v6  ;;  %vm779_vm1 = vweird.f32 %v1540_v6 }
  0x6a   :  { %314 = vadd.xlane.f32.xlu1 %v286_v52  ;;  %312 = vadd.xlane.f32.xlu0 %v285_v53  ;;  %v161_v52 = vld [vmem:[%s2606_s1 + $0x48] sm:$0xff] }
  0x6b   :  { %316 = vadd.xlane.f32.xlu2 %v287_v54 }
  0x72   :  { %320 = vadd.xlane.f32.xlu1 %v289_v61  ;;  %318 = vadd.xlane.f32.xlu0 %v288_v62  ;;  %v1500_v62 = vperm.slane %v615_v48, 0  ;;  %v1591_v48 = vpop.eup %1255 }
  0x73   :  { %462 = vadd.xlane.f32.xlu2 %v446_v63  ;;  %v159_v63 = vld [vmem:[%s2606_s1 + $0x38] sm:$0xff]  ;;  %vm780_vm2 = vweird.f32 %v1591_v48 }
  0x74   :  { %v620_v19 = vmul.f32 %v1295_v25, %v1500_v62  ;;  %v622_v32 = vmul.f32 %v1298_v27, %v1500_v62  ;;  %vm1697_vm3 = vmor %vm779_vm1, %vm780_vm2 }
  0x7a   :  { %466 = vadd.xlane.f32.xlu1 %v448_v2  ;;  %464 = vadd.xlane.f32.xlu0 %v447_v3  ;;  %v155_v2 = vld [vmem:[%s2606_s1 + $0x18] sm:$0xff] }
  0x7b   :  { %468 = vadd.xlane.f32.xlu2 %v449_v4 }
  0x82   :  { %472 = vadd.xlane.f32.xlu1 %v451_v5  ;;  %470 = vadd.xlane.f32.xlu0 %v450_v10  ;;  %v619_v5 = vmul.f32 %v1318_v35, %v1500_v62  ;;  %v162_v10 = vld [vmem:[%s2606_s1 + $0x50] sm:$0xff] }
  0x83   :  { %474 = vadd.xlane.f32.xlu2 %v452_v13 }
  0x8a   :  { %478 = vadd.xlane.f32.xlu1 %v454_v15  ;;  %476 = vadd.xlane.f32.xlu0 %v453_v16  ;;  %v618_v15 = vmul.f32 %v1291_v23, %v1500_v62  ;;  %v163_v16 = vld [vmem:[%s2606_s1 + $0x58] sm:$0xff] }
  0x8b   :  { %480 = vadd.xlane.f32.xlu2 %v455_v18 }
  0x92   :  { %484 = vadd.xlane.f32.xlu1 %v457_v21  ;;  %482 = vadd.xlane.f32.xlu0 %v456_v24 }
  0x93   :  { %486 = vadd.xlane.f32.xlu2 %v458_v9  ;;  %v164_v9 = vld [vmem:[%s2606_s1 + $0x60] sm:$0xff] }
  0x95   :  { %v122_v40 = vpop.xlane.xlu1 %121  ;;  %v118_v41 = vpop.xlane.xlu0 %117 }
  0x96   :  { %v188_v49 = vmul.f32 %v156_v33, %v122_v40  ;;  %v189_v50 = vmul.f32 %v157_v37, %v122_v40  ;;  %v184_v51 = vmul.f32 %v152_v38, %v118_v41  ;;  %v126_v53 = vpop.xlane.xlu2 %125  ;;  %v185_v54 = vmul.f32 %v153_v39, %v118_v41  ;;  %v169_v40 = vld [vmem:[%s2606_s1 + $0x88] sm:$0xff] }
  0x97   :  { %v192_v59 = vmul.f32 %v160_v47, %v126_v53  ;;  %v193_v61 = vmul.f32 %v161_v52, %v126_v53  ;;  %v621_v39 = vmul.f32 %v1315_v34, %v1500_v62  ;;  %v170_v52 = vld [vmem:[%s2606_s1 + $0x90] sm:$0xff]  ;;  %v171_v53 = vld [vmem:[%s2606_s1 + $0x98] sm:$0xff] }
  0x98   :  { %223 = vst [vmem:[%s2607_s2 + $0x20] sm:$0xff] %v188_v49 }
  0x99   :  { %224 = vst.msk [vmem:[%s2607_s2 + $0x28] sm:$0xff] %vm219_vm0, %v189_v50  ;;  %v172_v50 = vld [vmem:[%s2606_s1 + $0xa0] sm:$0xff] }
  0x9a   :  { %218 = vst [vmem:[%s2607_s2] sm:$0xff] %v184_v51  ;;  %490 = vadd.xlane.f32.xlu1 %v460_v42  ;;  %488 = vadd.xlane.f32.xlu0 %v459_v43  ;;  %v623_v43 = vmul.f32 %v1322_v36, %v1500_v62  ;;  %v173_v51 = vld [vmem:[%s2606_s1 + $0xa8] sm:$0xff] }
  0x9b   :  { %220 = vst.msk [vmem:[%s2607_s2 + $0x8] sm:$0xff] %vm219_vm0, %v185_v54  ;;  %492 = vadd.xlane.f32.xlu2 %v461_v58  ;;  %v775_v54 = vmul.f32 %v1591_v48, %v1540_v6 }
  0x9c   :  { %227 = vst [vmem:[%s2607_s2 + $0x40] sm:$0xff] %v192_v59 }
  0x9d   :  { %228 = vst.msk [vmem:[%s2607_s2 + $0x48] sm:$0xff] %vm219_vm0, %v193_v61  ;;  %v124_v3 = vpop.xlane.xlu1 %123  ;;  %v120_v4 = vpop.xlane.xlu0 %119  ;;  %v625_v61 = vmul.f32 %v1337_v44, %v1500_v62 }
  0x9e   :  { %v190_v11 = vmul.f32 %v158_v60, %v124_v3  ;;  %v191_v13 = vmul.f32 %v159_v63, %v124_v3  ;;  %v186_v14 = vmul.f32 %v154_v0, %v120_v4  ;;  %v128_v17 = vpop.xlane.xlu2 %127  ;;  %v187_v18 = vmul.f32 %v155_v2, %v120_v4  ;;  %v174_v60 = vld [vmem:[%s2606_s1 + $0xb0] sm:$0xff]  ;;  %v175_v3 = vld [vmem:[%s2606_s1 + $0xb8] sm:$0xff] }
  0x9f   :  { %v194_v21 = vmul.f32 %v162_v10, %v128_v17  ;;  %v195_v24 = vmul.f32 %v163_v16, %v128_v17  ;;  %v624_v2 = vmul.f32 %v1340_v45, %v1500_v62  ;;  %v626_v10 = vmul.f32 %v1343_v46, %v1500_v62  ;;  %v179_v16 = vld [vmem:[%s2606_s1 + $0xd8] sm:$0xff]  ;;  %v176_v17 = vld [vmem:[%s2606_s1 + $0xc0] sm:$0xff] }
  0xa0   :  { %225 = vst [vmem:[%s2607_s2 + $0x30] sm:$0xff] %v190_v11 }
  0xa1   :  { %226 = vst.msk [vmem:[%s2607_s2 + $0x38] sm:$0xff] %vm219_vm0, %v191_v13  ;;  %v776_v13 = vsub.f32 1.0, %v775_v54 }
  0xa2   :  { %221 = vst [vmem:[%s2607_s2 + $0x10] sm:$0xff] %v186_v14  ;;  %636 = vadd.xlane.f32.xlu1 %v619_v5  ;;  %634 = vadd.xlane.f32.xlu0 %v618_v15  ;;  %v178_v15 = vld [vmem:[%s2606_s1 + $0xd0] sm:$0xff] }
  0xa3   :  { %222 = vst.msk [vmem:[%s2607_s2 + $0x18] sm:$0xff] %vm219_vm0, %v187_v18  ;;  %638 = vadd.xlane.f32.xlu2 %v620_v19  ;;  %v177_v18 = vld [vmem:[%s2606_s1 + $0xc8] sm:$0xff]  ;;  %v777_v19 = vmul.f32 %v1591_v48, %v776_v13  ;;  %v980_v13 = vld [vmem:[%s2606_s1 + $0x130] sm:$0xff] }
  0xa4   :  { %229 = vst [vmem:[%s2607_s2 + $0x50] sm:$0xff] %v194_v21 }
  0xa5   :  { %230 = vst.msk [vmem:[%s2607_s2 + $0x58] sm:$0xff] %vm219_vm0, %v195_v24  ;;  %v132_v22 = vpop.xlane.xlu1 %131  ;;  %v130_v31 = vpop.xlane.xlu0 %129 }
  0xa6   :  { %v198_v33 = vmul.f32 %v166_v26, %v132_v22  ;;  %v199_v37 = vmul.f32 %v167_v28, %v132_v22  ;;  %v196_v38 = vmul.f32 %v164_v9, %v130_v31  ;;  %v134_v41 = vpop.xlane.xlu2 %133  ;;  %v197_v42 = vmul.f32 %v165_v30, %v130_v31  ;;  %v180_v9 = vld [vmem:[%s2606_s1 + $0xe0] sm:$0xff] }
  0xa7   :  { %v200_v47 = vmul.f32 %v168_v29, %v134_v41  ;;  %v201_v49 = vmul.f32 %v169_v40, %v134_v41  ;;  %v628_v26 = vmul.f32 %v1359_v55, %v1500_v62  ;;  %v627_v28 = vmul.f32 %v1362_v56, %v1500_v62 }
  0xa8   :  { %233 = vst [vmem:[%s2607_s2 + $0x70] sm:$0xff] %v198_v33  ;;  %v778_v40 = vadd.f32 %v1591_v48, %v777_v19  ;;  %v783_v41 = vand.u32 2147483647, %v1540_v6  ;;  %v633_v19 = vmul.f32 %v1409_v20, %v1500_v62 }
  0xa9   :  { %234 = vst.msk [vmem:[%s2607_s2 + $0x78] sm:$0xff] %vm219_vm0, %v199_v37  ;;  %v629_v37 = vmul.f32 %v1365_v57, %v1500_v62 }
  0xaa   :  { %231 = vst [vmem:[%s2607_s2 + $0x60] sm:$0xff] %v196_v38  ;;  %642 = vadd.xlane.f32.xlu1 %v622_v32  ;;  %640 = vadd.xlane.f32.xlu0 %v621_v39  ;;  %v181_v32 = vld [vmem:[%s2606_s1 + $0xe8] sm:$0xff]  ;;  %v785_v38 = vand.u32 2147483648, %v1540_v6  ;;  %vm784_vm4 = vcmp.eq.f32.partialorder %v783_v41, 8.507059e+37  ;;  %v988_v41 = vld [vmem:[%s2606_s1 + $0x170] sm:$0xff] }
  0xab   :  { %232 = vst.msk [vmem:[%s2607_s2 + $0x68] sm:$0xff] %vm219_vm0, %v197_v42  ;;  %644 = vadd.xlane.f32.xlu2 %v623_v43  ;;  %v975_v6 = vld [vmem:[%s2606_s1 + $0x108] sm:$0xff] }
  0xac   :  { %235 = vst [vmem:[%s2607_s2 + $0x80] sm:$0xff] %v200_v47  ;;  %v974_v47 = vld [vmem:[%s2606_s1 + $0x100] sm:$0xff] }
  0xad   :  { %236 = vst.msk [vmem:[%s2607_s2 + $0x88] sm:$0xff] %vm219_vm0, %v201_v49  ;;  %v138_v58 = vpop.xlane.xlu1 %137  ;;  %v136_v59 = vpop.xlane.xlu0 %135  ;;  %v182_v49 = vld [vmem:[%s2606_s1 + $0xf0] sm:$0xff] }
  0xae   :  { %v204_v63 = vmul.f32 %v172_v50, %v138_v58  ;;  %v205_v0 = vmul.f32 %v173_v51, %v138_v58  ;;  %v202_v1 = vmul.f32 %v170_v52, %v136_v59  ;;  %v140_v4 = vpop.xlane.xlu2 %139  ;;  %v203_v5 = vmul.f32 %v171_v53, %v136_v59  ;;  %v183_v51 = vld [vmem:[%s2606_s1 + $0xf8] sm:$0xff]  ;;  %v976_v59 = vld [vmem:[%s2606_s1 + $0x110] sm:$0xff] }
  0xaf   :  { %v206_v11 = vmul.f32 %v174_v60, %v140_v4  ;;  %v207_v14 = vmul.f32 %v175_v3, %v140_v4  ;;  %v786_v50 = vor.u32 1.1754944e-38, %v785_v38  ;;  %v782_v52 = vsel %vm1697_vm3, %v1591_v48, %v778_v40 }
  0xb0   :  { %239 = vst [vmem:[%s2607_s2 + $0xa0] sm:$0xff] %v204_v63  ;;  %v631_v58 = vmul.f32 %v1390_v7, %v1500_v62  ;;  %v630_v48 = vmul.f32 %v1393_v8, %v1500_v62  ;;  %v632_v3 = vmul.f32 %v1396_v12, %v1500_v62 }
  0xb1   :  { %240 = vst.msk [vmem:[%s2607_s2 + $0xa8] sm:$0xff] %vm219_vm0, %v205_v0  ;;  %v977_v0 = vld [vmem:[%s2606_s1 + $0x118] sm:$0xff]  ;;  %v787_v4 = vsel %vm784_vm4, %v786_v50, %v782_v52 }
  0xb2   :  { %237 = vst [vmem:[%s2607_s2 + $0x90] sm:$0xff] %v202_v1  ;;  %648 = vadd.xlane.f32.xlu1 %v625_v61  ;;  %646 = vadd.xlane.f32.xlu0 %v624_v2 }
  0xb3   :  { %238 = vst.msk [vmem:[%s2607_s2 + $0x98] sm:$0xff] %vm219_vm0, %v203_v5  ;;  %650 = vadd.xlane.f32.xlu2 %v626_v10 }
  0xb4   :  { %241 = vst [vmem:[%s2607_s2 + $0xb0] sm:$0xff] %v206_v11  ;;  %v1752_v11 = vperm.slane %v787_v4, 0 }
  0xb5   :  { %242 = vst.msk [vmem:[%s2607_s2 + $0xb8] sm:$0xff] %vm219_vm0, %v207_v14  ;;  %v144_v21 = vpop.xlane.xlu1 %143  ;;  %v142_v24 = vpop.xlane.xlu0 %141  ;;  %v981_v14 = vld [vmem:[%s2606_s1 + $0x138] sm:$0xff] }
  0xb6   :  { %v210_v30 = vmul.f32 %v178_v15, %v144_v21  ;;  %v211_v22 = vmul.f32 %v179_v16, %v144_v21  ;;  %v208_v31 = vmul.f32 %v176_v17, %v142_v24  ;;  %v146_v29 = vpop.xlane.xlu2 %145  ;;  %v209_v33 = vmul.f32 %v177_v18, %v142_v24  ;;  %v978_v15 = vld [vmem:[%s2606_s1 + $0x120] sm:$0xff]  ;;  %v979_v16 = vld [vmem:[%s2606_s1 + $0x128] sm:$0xff] }
  0xb7   :  { %v212_v39 = vmul.f32 %v180_v9, %v146_v29  ;;  %v213_v42 = vmul.f32 %v181_v32, %v146_v29  ;;  %v982_v21 = vld [vmem:[%s2606_s1 + $0x140] sm:$0xff]  ;;  %v790_v9 = vmul.f32 %v1291_v23, %v1752_v11  ;;  %v791_v32 = vmul.f32 %v1318_v35, %v1752_v11  ;;  %v987_v29 = vld [vmem:[%s2606_s1 + $0x168] sm:$0xff] }
  0xb8   :  { %245 = vst [vmem:[%s2607_s2 + $0xd0] sm:$0xff] %v210_v30  ;;  %v983_v30 = vld [vmem:[%s2606_s1 + $0x148] sm:$0xff]  ;;  %v986_v35 = vld [vmem:[%s2606_s1 + $0x160] sm:$0xff]  ;;  %v793_v40 = vmul.f32 %v1315_v34, %v1752_v11  ;;  %v794_v52 = vmul.f32 %v1298_v27, %v1752_v11  ;;  %v992_v27 = vld [vmem:[%s2606_s1 + $0x190] sm:$0xff] }
  0xb9   :  { %246 = vst.msk [vmem:[%s2607_s2 + $0xd8] sm:$0xff] %vm219_vm0, %v211_v22 }
  0xba   :  { %243 = vst [vmem:[%s2607_s2 + $0xc0] sm:$0xff] %v208_v31  ;;  %654 = vadd.xlane.f32.xlu1 %v628_v26  ;;  %652 = vadd.xlane.f32.xlu0 %v627_v28 }
  0xbb   :  { %244 = vst.msk [vmem:[%s2607_s2 + $0xc8] sm:$0xff] %vm219_vm0, %v209_v33  ;;  %656 = vadd.xlane.f32.xlu2 %v629_v37  ;;  %v984_v33 = vld [vmem:[%s2606_s1 + $0x150] sm:$0xff]  ;;  %v985_v37 = vld [vmem:[%s2606_s1 + $0x158] sm:$0xff] }
  0xbc   :  { %247 = vst [vmem:[%s2607_s2 + $0xe0] sm:$0xff] %v212_v39 }
  0xbd   :  { %248 = vst.msk [vmem:[%s2607_s2 + $0xe8] sm:$0xff] %vm219_vm0, %v213_v42  ;;  %v291_v53 = vpop.xlane.xlu1 %290  ;;  %v148_v54 = vpop.xlane.xlu0 %147 }
  0xbe   :  { %v357_v61 = vmul.f32 %v974_v47, %v291_v53  ;;  %v358_v60 = vmul.f32 %v975_v6, %v291_v53  ;;  %v214_v63 = vmul.f32 %v182_v49, %v148_v54  ;;  %v293_v1 = vpop.xlane.xlu2 %292  ;;  %v215_v2 = vmul.f32 %v183_v51, %v148_v54  ;;  %v989_v49 = vld [vmem:[%s2606_s1 + $0x178] sm:$0xff]  ;;  %v990_v54 = vld [vmem:[%s2606_s1 + $0x180] sm:$0xff] }
  0xbf   :  { %v359_v5 = vmul.f32 %v976_v59, %v293_v1  ;;  %v360_v10 = vmul.f32 %v977_v0, %v293_v1  ;;  %v792_v6 = vmul.f32 %v1295_v25, %v1752_v11  ;;  %v993_v53 = vld [vmem:[%s2606_s1 + $0x198] sm:$0xff] }
  0xc0   :  { %1006 = vst [vmem:[%s2607_s2 + $0x100] sm:$0xff] %v357_v61 }
  0xc1   :  { %1007 = vst.msk [vmem:[%s2607_s2 + $0x108] sm:$0xff] %vm219_vm0, %v358_v60  ;;  %v796_v60 = vmul.f32 %v1340_v45, %v1752_v11 }
  0xc2   :  { %249 = vst [vmem:[%s2607_s2 + $0xf0] sm:$0xff] %v214_v63  ;;  %660 = vadd.xlane.f32.xlu1 %v631_v58  ;;  %658 = vadd.xlane.f32.xlu0 %v630_v48  ;;  %v991_v58 = vld [vmem:[%s2606_s1 + $0x188] sm:$0xff]  ;;  %v994_v63 = vld [vmem:[%s2606_s1 + $0x1a0] sm:$0xff] }
  0xc3   :  { %250 = vst.msk [vmem:[%s2607_s2 + $0xf8] sm:$0xff] %vm219_vm0, %v215_v2  ;;  %662 = vadd.xlane.f32.xlu2 %v632_v3  ;;  %v795_v2 = vmul.f32 %v1322_v36, %v1752_v11  ;;  %v995_v3 = vld [vmem:[%s2606_s1 + $0x1a8] sm:$0xff] }
  0xc4   :  { %1008 = vst [vmem:[%s2607_s2 + $0x110] sm:$0xff] %v359_v5 }
  0xc5   :  { %1009 = vst.msk [vmem:[%s2607_s2 + $0x118] sm:$0xff] %vm219_vm0, %v360_v10  ;;  %v297_v17 = vpop.xlane.xlu1 %296  ;;  %v295_v18 = vpop.xlane.xlu0 %294  ;;  %v797_v10 = vmul.f32 %v1337_v44, %v1752_v11  ;;  %v998_v44 = vld [vmem:[%s2606_s1 + $0x1c0] sm:$0xff] }
  0xc6   :  { %v363_v24 = vmul.f32 %v980_v13, %v297_v17  ;;  %v364_v26 = vmul.f32 %v981_v14, %v297_v17  ;;  %v361_v28 = vmul.f32 %v978_v15, %v295_v18  ;;  %v299_v22 = vpop.xlane.xlu2 %298  ;;  %v362_v31 = vmul.f32 %v979_v16, %v295_v18  ;;  %v999_v13 = vld [vmem:[%s2606_s1 + $0x1c8] sm:$0xff]  ;;  %v996_v14 = vld [vmem:[%s2606_s1 + $0x1b0] sm:$0xff]  ;;  %v997_v15 = vld [vmem:[%s2606_s1 + $0x1b8] sm:$0xff] }
  0xc7   :  { %v365_v62 = vmul.f32 %v982_v21, %v299_v22  ;;  %v366_v23 = vmul.f32 %v983_v30, %v299_v22  ;;  %v799_v18 = vmul.f32 %v1362_v56, %v1752_v11 }
  0xc8   :  { %1012 = vst [vmem:[%s2607_s2 + $0x130] sm:$0xff] %v363_v24 }
  0xc9   :  { %1013 = vst.msk [vmem:[%s2607_s2 + $0x138] sm:$0xff] %vm219_vm0, %v364_v26 }
  0xca   :  { %1010 = vst [vmem:[%s2607_s2 + $0x120] sm:$0xff] %v361_v28  ;;  %806 = vadd.xlane.f32.xlu1 %v790_v9  ;;  %664 = vadd.xlane.f32.xlu0 %v633_v19  ;;  %v1000_v19 = vld [vmem:[%s2606_s1 + $0x1d0] sm:$0xff]  ;;  %v798_v28 = vmul.f32 %v1343_v46, %v1752_v11  ;;  %v1001_v9 = vld [vmem:[%s2606_s1 + $0x1d8] sm:$0xff] }
  0xcb   :  { %1011 = vst.msk [vmem:[%s2607_s2 + $0x128] sm:$0xff] %vm219_vm0, %v362_v31  ;;  %808 = vadd.xlane.f32.xlu2 %v791_v32  ;;  %v800_v31 = vmul.f32 %v1359_v55, %v1752_v11  ;;  %v1004_v55 = vld [vmem:[%s2606_s1 + $0x1f0] sm:$0xff]  ;;  %v1005_v32 = vld [vmem:[%s2606_s1 + $0x1f8] sm:$0xff] }
  0xcc   :  { %1014 = vst [vmem:[%s2607_s2 + $0x140] sm:$0xff] %v365_v62  ;;  %v1002_v62 = vld [vmem:[%s2606_s1 + $0x1e0] sm:$0xff] }
  0xcd   :  { %1015 = vst.msk [vmem:[%s2607_s2 + $0x148] sm:$0xff] %vm219_vm0, %v366_v23  ;;  %v303_v38 = vpop.xlane.xlu1 %302  ;;  %v301_v39 = vpop.xlane.xlu0 %300  ;;  %v1003_v23 = vld [vmem:[%s2606_s1 + $0x1e8] sm:$0xff] }
  0xce   :  { %v369_v42 = vmul.f32 %v986_v35, %v303_v38  ;;  %v370_v43 = vmul.f32 %v987_v29, %v303_v38  ;;  %v367_v47 = vmul.f32 %v984_v33, %v301_v39  ;;  %v305_v50 = vpop.xlane.xlu2 %304  ;;  %v368_v51 = vmul.f32 %v985_v37, %v301_v39  ;;  %v1040_v37 = vld [vmem:[%s2606_s1 + $0x200] sm:$0xff] }
  0xcf   :  { %v371_v34 = vmul.f32 %v988_v41, %v305_v50  ;;  %v372_v25 = vmul.f32 %v989_v49, %v305_v50  ;;  %v802_v33 = vmul.f32 %v1393_v8, %v1752_v11  ;;  %v801_v41 = vmul.f32 %v1365_v57, %v1752_v11  ;;  %v1045_v49 = vld [vmem:[%s2606_s1 + $0x228] sm:$0xff]  ;;  %v1042_v50 = vld [vmem:[%s2606_s1 + $0x210] sm:$0xff] }
  0xd0   :  { %1018 = vst [vmem:[%s2607_s2 + $0x160] sm:$0xff] %v369_v42  ;;  %v1041_v42 = vld [vmem:[%s2606_s1 + $0x208] sm:$0xff] }
  0xd1   :  { %1019 = vst.msk [vmem:[%s2607_s2 + $0x168] sm:$0xff] %vm219_vm0, %v370_v43 }
  0xd2   :  { %1016 = vst [vmem:[%s2607_s2 + $0x150] sm:$0xff] %v367_v47  ;;  %812 = vadd.xlane.f32.xlu1 %v793_v40  ;;  %810 = vadd.xlane.f32.xlu0 %v792_v6  ;;  %v803_v6 = vmul.f32 %v1390_v7, %v1752_v11  ;;  %v1044_v7 = vld [vmem:[%s2606_s1 + $0x220] sm:$0xff] }
  0xd3   :  { %1017 = vst.msk [vmem:[%s2607_s2 + $0x158] sm:$0xff] %vm219_vm0, %v368_v51  ;;  %814 = vadd.xlane.f32.xlu2 %v794_v52  ;;  %v1043_v51 = vld [vmem:[%s2606_s1 + $0x218] sm:$0xff] }
  0xd4   :  { %1020 = vst [vmem:[%s2607_s2 + $0x170] sm:$0xff] %v371_v34 }
  0xd5   :  { %1021 = vst.msk [vmem:[%s2607_s2 + $0x178] sm:$0xff] %vm219_vm0, %v372_v25  ;;  %v309_v59 = vpop.xlane.xlu1 %308  ;;  %v307_v61 = vpop.xlane.xlu0 %306  ;;  %v805_v25 = vmul.f32 %v1409_v20, %v1752_v11 }
  0xd6   :  { %v375_v48 = vmul.f32 %v992_v27, %v309_v59  ;;  %v376_v0 = vmul.f32 %v993_v53, %v309_v59  ;;  %v373_v1 = vmul.f32 %v990_v54, %v307_v61  ;;  %v311_v4 = vpop.xlane.xlu2 %310  ;;  %v374_v5 = vmul.f32 %v991_v58, %v307_v61  ;;  %v1046_v27 = vld [vmem:[%s2606_s1 + $0x230] sm:$0xff]  ;;  %v1047_v61 = vld [vmem:[%s2606_s1 + $0x238] sm:$0xff] }
  0xd7   :  { %v377_v45 = vmul.f32 %v994_v63, %v311_v4  ;;  %v378_v36 = vmul.f32 %v995_v3, %v311_v4  ;;  %v804_v59 = vmul.f32 %v1396_v12, %v1752_v11  ;;  %v1050_v12 = vld [vmem:[%s2606_s1 + $0x250] sm:$0xff]  ;;  %v1051_v11 = vld [vmem:[%s2606_s1 + $0x258] sm:$0xff]  ;;  %v1052_v4 = vld [vmem:[%s2606_s1 + $0x260] sm:$0xff] }
  0xd8   :  { %1024 = vst [vmem:[%s2607_s2 + $0x190] sm:$0xff] %v375_v48 }
  0xd9   :  { %1025 = vst.msk [vmem:[%s2607_s2 + $0x198] sm:$0xff] %vm219_vm0, %v376_v0  ;;  %v1048_v0 = vld [vmem:[%s2606_s1 + $0x240] sm:$0xff] }
  0xda   :  { %1022 = vst [vmem:[%s2607_s2 + $0x180] sm:$0xff] %v373_v1  ;;  %818 = vadd.xlane.f32.xlu1 %v796_v60  ;;  %816 = vadd.xlane.f32.xlu0 %v795_v2  ;;  %v1049_v1 = vld [vmem:[%s2606_s1 + $0x248] sm:$0xff] }
  0xdb   :  { %1023 = vst.msk [vmem:[%s2607_s2 + $0x188] sm:$0xff] %vm219_vm0, %v374_v5  ;;  %820 = vadd.xlane.f32.xlu2 %v797_v10 }
  0xdc   :  { %1026 = vst [vmem:[%s2607_s2 + $0x1a0] sm:$0xff] %v377_v45 }
  0xdd   :  { %1027 = vst.msk [vmem:[%s2607_s2 + $0x1a8] sm:$0xff] %vm219_vm0, %v378_v36  ;;  %v315_v16 = vpop.xlane.xlu1 %314  ;;  %v313_v17 = vpop.xlane.xlu0 %312  ;;  %v1053_v36 = vld [vmem:[%s2606_s1 + $0x268] sm:$0xff] }
  0xde   :  { %v381_v21 = vmul.f32 %v998_v44, %v315_v16  ;;  %v382_v24 = vmul.f32 %v999_v13, %v315_v16  ;;  %v379_v26 = vmul.f32 %v996_v14, %v313_v17  ;;  %v317_v30 = vpop.xlane.xlu2 %316  ;;  %v380_v22 = vmul.f32 %v997_v15, %v313_v17  ;;  %v1056_v16 = vld [vmem:[%s2606_s1 + $0x280] sm:$0xff]  ;;  %v1057_v17 = vld [vmem:[%s2606_s1 + $0x288] sm:$0xff] }
  0xdf   :  { %v383_v56 = vmul.f32 %v1000_v19, %v317_v30  ;;  %v384_v46 = vmul.f32 %v1001_v9, %v317_v30  ;;  %v1055_v19 = vld [vmem:[%s2606_s1 + $0x278] sm:$0xff] }
  0xe0   :  { %1030 = vst [vmem:[%s2607_s2 + $0x1c0] sm:$0xff] %v381_v21 }
  0xe1   :  { %1031 = vst.msk [vmem:[%s2607_s2 + $0x1c8] sm:$0xff] %vm219_vm0, %v382_v24 }
  0xe2   :  { %1028 = vst [vmem:[%s2607_s2 + $0x1b0] sm:$0xff] %v379_v26  ;;  %824 = vadd.xlane.f32.xlu1 %v799_v18  ;;  %822 = vadd.xlane.f32.xlu0 %v798_v28  ;;  %v1054_v18 = vld [vmem:[%s2606_s1 + $0x270] sm:$0xff] }
  0xe3   :  { %1029 = vst.msk [vmem:[%s2607_s2 + $0x1b8] sm:$0xff] %vm219_vm0, %v380_v22  ;;  %826 = vadd.xlane.f32.xlu2 %v800_v31  ;;  %v1058_v26 = vld [vmem:[%s2606_s1 + $0x290] sm:$0xff]  ;;  %v1059_v22 = vld [vmem:[%s2606_s1 + $0x298] sm:$0xff] }
  0xe4   :  { %1032 = vst [vmem:[%s2607_s2 + $0x1d0] sm:$0xff] %v383_v56 }
  0xe5   :  { %1033 = vst.msk [vmem:[%s2607_s2 + $0x1d8] sm:$0xff] %vm219_vm0, %v384_v46  ;;  %v321_v35 = vpop.xlane.xlu1 %320  ;;  %v319_v29 = vpop.xlane.xlu0 %318 }
  0xe6   :  { %v387_v38 = vmul.f32 %v1004_v55, %v321_v35  ;;  %v388_v39 = vmul.f32 %v1005_v32, %v321_v35  ;;  %v385_v40 = vmul.f32 %v1002_v62, %v319_v29  ;;  %v463_v43 = vpop.xlane.xlu2 %462  ;;  %v386_v47 = vmul.f32 %v1003_v23, %v319_v29  ;;  %v1062_v32 = vld [vmem:[%s2606_s1 + $0x2b0] sm:$0xff]  ;;  %v1063_v62 = vld [vmem:[%s2606_s1 + $0x2b8] sm:$0xff]  ;;  %v1060_v23 = vld [vmem:[%s2606_s1 + $0x2a0] sm:$0xff] }
  0xe7   :  { %v529_v8 = vmul.f32 %v1040_v37, %v463_v43  ;;  %v530_v57 = vmul.f32 %v1041_v42, %v463_v43  ;;  %v1061_v35 = vld [vmem:[%s2606_s1 + $0x2a8] sm:$0xff]  ;;  %v1064_v37 = vld [vmem:[%s2606_s1 + $0x2c0] sm:$0xff] }
  0xe8   :  { %1036 = vst [vmem:[%s2607_s2 + $0x1f0] sm:$0xff] %v387_v38 }
  0xe9   :  { %1037 = vst.msk [vmem:[%s2607_s2 + $0x1f8] sm:$0xff] %vm219_vm0, %v388_v39 }
  0xea   :  { %1034 = vst [vmem:[%s2607_s2 + $0x1e0] sm:$0xff] %v385_v40  ;;  %830 = vadd.xlane.f32.xlu1 %v802_v33  ;;  %828 = vadd.xlane.f32.xlu0 %v801_v41  ;;  %v1065_v41 = vld [vmem:[%s2606_s1 + $0x2c8] sm:$0xff] }
  0xeb   :  { %1035 = vst.msk [vmem:[%s2607_s2 + $0x1e8] sm:$0xff] %vm219_vm0, %v386_v47  ;;  %832 = vadd.xlane.f32.xlu2 %v803_v6 }
  0xec   :  { %1072 = vst [vmem:[%s2607_s2 + $0x200] sm:$0xff] %v529_v8  ;;  %v1068_v8 = vld [vmem:[%s2606_s1 + $0x2e0] sm:$0xff] }
  0xed   :  { %1073 = vst.msk [vmem:[%s2607_s2 + $0x208] sm:$0xff] %vm219_vm0, %v530_v57  ;;  %v467_v52 = vpop.xlane.xlu1 %466  ;;  %v465_v34 = vpop.xlane.xlu0 %464  ;;  %v1069_v57 = vld [vmem:[%s2606_s1 + $0x2e8] sm:$0xff] }
  0xee   :  { %v533_v53 = vmul.f32 %v1044_v7, %v467_v52  ;;  %v534_v54 = vmul.f32 %v1045_v49, %v467_v52  ;;  %v531_v58 = vmul.f32 %v1042_v50, %v465_v34  ;;  %v469_v60 = vpop.xlane.xlu2 %468  ;;  %v532_v63 = vmul.f32 %v1043_v51, %v465_v34  ;;  %v1066_v7 = vld [vmem:[%s2606_s1 + $0x2d0] sm:$0xff]  ;;  %v1067_v49 = vld [vmem:[%s2606_s1 + $0x2d8] sm:$0xff] }
  0xef   :  { %v535_v20 = vmul.f32 %v1046_v27, %v469_v60  ;;  %v536_v48 = vmul.f32 %v1047_v61, %v469_v60  ;;  %v1070_v52 = vld [vmem:[%s2606_s1 + $0x2f0] sm:$0xff] }
  0xf0   :  { %1076 = vst [vmem:[%s2607_s2 + $0x220] sm:$0xff] %v533_v53  ;;  %v1071_v53 = vld [vmem:[%s2606_s1 + $0x2f8] sm:$0xff]  ;;  %v1108_v60 = vld [vmem:[%s2606_s1 + $0x310] sm:$0xff] }
  0xf1   :  { %1077 = vst.msk [vmem:[%s2607_s2 + $0x228] sm:$0xff] %vm219_vm0, %v534_v54 }
  0xf2   :  { %1074 = vst [vmem:[%s2607_s2 + $0x210] sm:$0xff] %v531_v58  ;;  %836 = vadd.xlane.f32.xlu1 %v805_v25  ;;  %834 = vadd.xlane.f32.xlu0 %v804_v59 }
  0xf3   :  { %1075 = vst.msk [vmem:[%s2607_s2 + $0x218] sm:$0xff] %vm219_vm0, %v532_v63  ;;  %v1109_v63 = vld [vmem:[%s2606_s1 + $0x318] sm:$0xff] }
  0xf4   :  { %1078 = vst [vmem:[%s2607_s2 + $0x230] sm:$0xff] %v535_v20  ;;  %v1106_v20 = vld [vmem:[%s2606_s1 + $0x300] sm:$0xff] }
  0xf5   :  { %1079 = vst.msk [vmem:[%s2607_s2 + $0x238] sm:$0xff] %vm219_vm0, %v536_v48  ;;  %v473_v2 = vpop.xlane.xlu1 %472  ;;  %v471_v3 = vpop.xlane.xlu0 %470  ;;  %v1107_v48 = vld [vmem:[%s2606_s1 + $0x308] sm:$0xff] }
  0xf6   :  { %v539_v5 = vmul.f32 %v1050_v12, %v473_v2  ;;  %v540_v10 = vmul.f32 %v1051_v11, %v473_v2  ;;  %v537_v45 = vmul.f32 %v1048_v0, %v471_v3  ;;  %v475_v44 = vpop.xlane.xlu2 %474  ;;  %v538_v13 = vmul.f32 %v1049_v1, %v471_v3  ;;  %v1110_v0 = vld [vmem:[%s2606_s1 + $0x320] sm:$0xff] }
  0xf7   :  { %v541_v14 = vmul.f32 %v1052_v4, %v475_v44  ;;  %v542_v15 = vmul.f32 %v1053_v36, %v475_v44  ;;  %v1111_v4 = vld [vmem:[%s2606_s1 + $0x328] sm:$0xff]  ;;  %v1114_v44 = vld [vmem:[%s2606_s1 + $0x340] sm:$0xff] }
  0xf8   :  { %1082 = vst [vmem:[%s2607_s2 + $0x250] sm:$0xff] %v539_v5 }
  0xf9   :  { %1083 = vst.msk [vmem:[%s2607_s2 + $0x258] sm:$0xff] %vm219_vm0, %v540_v10 }
  0xfa   :  { %1080 = vst [vmem:[%s2607_s2 + $0x240] sm:$0xff] %v537_v45 }
  0xfb   :  { %1081 = vst.msk [vmem:[%s2607_s2 + $0x248] sm:$0xff] %vm219_vm0, %v538_v13  ;;  %v1115_v13 = vld [vmem:[%s2606_s1 + $0x348] sm:$0xff] }
  0xfc   :  { %1084 = vst [vmem:[%s2607_s2 + $0x260] sm:$0xff] %v541_v14  ;;  %v1112_v14 = vld [vmem:[%s2606_s1 + $0x330] sm:$0xff] }
  0xfd   :  { %1085 = vst.msk [vmem:[%s2607_s2 + $0x268] sm:$0xff] %vm219_vm0, %v542_v15  ;;  %v479_v21 = vpop.xlane.xlu1 %478  ;;  %v477_v24 = vpop.xlane.xlu0 %476  ;;  %v1113_v15 = vld [vmem:[%s2606_s1 + $0x338] sm:$0xff] }
  0xfe   :  { %v545_v28 = vmul.f32 %v1056_v16, %v479_v21  ;;  %v546_v9 = vmul.f32 %v1057_v17, %v479_v21  ;;  %v543_v30 = vmul.f32 %v1054_v18, %v477_v24  ;;  %v481_v31 = vpop.xlane.xlu2 %480  ;;  %v544_v56 = vmul.f32 %v1055_v19, %v477_v24  ;;  %v1116_v18 = vld [vmem:[%s2606_s1 + $0x350] sm:$0xff] }
  0xff   :  { %v547_v46 = vmul.f32 %v1058_v26, %v481_v31  ;;  %v548_v55 = vmul.f32 %v1059_v22, %v481_v31  ;;  %v1117_v26 = vld [vmem:[%s2606_s1 + $0x358] sm:$0xff]  ;;  %v1120_v31 = vld [vmem:[%s2606_s1 + $0x370] sm:$0xff] }
 0x100   :  { %1088 = vst [vmem:[%s2607_s2 + $0x280] sm:$0xff] %v545_v28 }
 0x101   :  { %1089 = vst.msk [vmem:[%s2607_s2 + $0x288] sm:$0xff] %vm219_vm0, %v546_v9 }
 0x102   :  { %1086 = vst [vmem:[%s2607_s2 + $0x270] sm:$0xff] %v543_v30 }
 0x103   :  { %1087 = vst.msk [vmem:[%s2607_s2 + $0x278] sm:$0xff] %vm219_vm0, %v544_v56  ;;  %v1121_v56 = vld [vmem:[%s2606_s1 + $0x378] sm:$0xff] }
 0x104   :  { %1090 = vst [vmem:[%s2607_s2 + $0x290] sm:$0xff] %v547_v46  ;;  %v1118_v46 = vld [vmem:[%s2606_s1 + $0x360] sm:$0xff] }
 0x105   :  { %1091 = vst.msk [vmem:[%s2607_s2 + $0x298] sm:$0xff] %vm219_vm0, %v548_v55  ;;  %v485_v29 = vpop.xlane.xlu1 %484  ;;  %v483_v33 = vpop.xlane.xlu0 %482  ;;  %v1119_v55 = vld [vmem:[%s2606_s1 + $0x368] sm:$0xff] }
 0x106   :  { %v551_v38 = vmul.f32 %v1062_v32, %v485_v29  ;;  %v552_v39 = vmul.f32 %v1063_v62, %v485_v29  ;;  %v549_v40 = vmul.f32 %v1060_v23, %v483_v33  ;;  %v487_v42 = vpop.xlane.xlu2 %486  ;;  %v550_v43 = vmul.f32 %v1061_v35, %v483_v33  ;;  %v1122_v23 = vld [vmem:[%s2606_s1 + $0x380] sm:$0xff] }
 0x107   :  { %v553_v47 = vmul.f32 %v1064_v37, %v487_v42  ;;  %v554_v6 = vmul.f32 %v1065_v41, %v487_v42  ;;  %v1123_v37 = vld [vmem:[%s2606_s1 + $0x388] sm:$0xff]  ;;  %v1126_v42 = vld [vmem:[%s2606_s1 + $0x3a0] sm:$0xff] }
 0x108   :  { %1094 = vst [vmem:[%s2607_s2 + $0x2b0] sm:$0xff] %v551_v38 }
 0x109   :  { %1095 = vst.msk [vmem:[%s2607_s2 + $0x2b8] sm:$0xff] %vm219_vm0, %v552_v39 }
 0x10a   :  { %1092 = vst [vmem:[%s2607_s2 + $0x2a0] sm:$0xff] %v549_v40 }
 0x10b   :  { %1093 = vst.msk [vmem:[%s2607_s2 + $0x2a8] sm:$0xff] %vm219_vm0, %v550_v43  ;;  %v1127_v43 = vld [vmem:[%s2606_s1 + $0x3a8] sm:$0xff] }
 0x10c   :  { %1096 = vst [vmem:[%s2607_s2 + $0x2c0] sm:$0xff] %v553_v47  ;;  %v1124_v47 = vld [vmem:[%s2606_s1 + $0x390] sm:$0xff] }
 0x10d   :  { %1097 = vst.msk [vmem:[%s2607_s2 + $0x2c8] sm:$0xff] %vm219_vm0, %v554_v6  ;;  %v491_v50 = vpop.xlane.xlu1 %490  ;;  %v489_v51 = vpop.xlane.xlu0 %488  ;;  %v1125_v6 = vld [vmem:[%s2606_s1 + $0x398] sm:$0xff] }
 0x10e   :  { %v557_v34 = vmul.f32 %v1068_v8, %v491_v50  ;;  %v558_v25 = vmul.f32 %v1069_v57, %v491_v50  ;;  %v555_v27 = vmul.f32 %v1066_v7, %v489_v51  ;;  %v493_v54 = vpop.xlane.xlu2 %492  ;;  %v556_v58 = vmul.f32 %v1067_v49, %v489_v51  ;;  %v1128_v7 = vld [vmem:[%s2606_s1 + $0x3b0] sm:$0xff] }
 0x10f   :  { %v559_v59 = vmul.f32 %v1070_v52, %v493_v54  ;;  %v560_v61 = vmul.f32 %v1071_v53, %v493_v54  ;;  %v1129_v52 = vld [vmem:[%s2606_s1 + $0x3b8] sm:$0xff]  ;;  %v1132_v54 = vld [vmem:[%s2606_s1 + $0x3d0] sm:$0xff] }
 0x110   :  { %1100 = vst [vmem:[%s2607_s2 + $0x2e0] sm:$0xff] %v557_v34 }
 0x111   :  { %1101 = vst.msk [vmem:[%s2607_s2 + $0x2e8] sm:$0xff] %vm219_vm0, %v558_v25 }
 0x112   :  { %1098 = vst [vmem:[%s2607_s2 + $0x2d0] sm:$0xff] %v555_v27 }
 0x113   :  { %1099 = vst.msk [vmem:[%s2607_s2 + $0x2d8] sm:$0xff] %vm219_vm0, %v556_v58  ;;  %v1133_v58 = vld [vmem:[%s2606_s1 + $0x3d8] sm:$0xff] }
 0x114   :  { %1102 = vst [vmem:[%s2607_s2 + $0x2f0] sm:$0xff] %v559_v59  ;;  %v1130_v59 = vld [vmem:[%s2606_s1 + $0x3c0] sm:$0xff] }
 0x115   :  { %1103 = vst.msk [vmem:[%s2607_s2 + $0x2f8] sm:$0xff] %vm219_vm0, %v560_v61  ;;  %v637_v12 = vpop.xlane.xlu1 %636  ;;  %v635_v11 = vpop.xlane.xlu0 %634  ;;  %v1131_v61 = vld [vmem:[%s2606_s1 + $0x3c8] sm:$0xff] }
 0x116   :  { %v703_v1 = vmul.f32 %v1108_v60, %v637_v12  ;;  %v704_v2 = vmul.f32 %v1109_v63, %v637_v12  ;;  %v701_v3 = vmul.f32 %v1106_v20, %v635_v11  ;;  %v639_v5 = vpop.xlane.xlu2 %638  ;;  %v702_v10 = vmul.f32 %v1107_v48, %v635_v11  ;;  %v1134_v20 = vld [vmem:[%s2606_s1 + $0x3e0] sm:$0xff] }
 0x117   :  { %v705_v45 = vmul.f32 %v1110_v0, %v639_v5  ;;  %v706_v36 = vmul.f32 %v1111_v4, %v639_v5  ;;  %v1135_v0 = vld [vmem:[%s2606_s1 + $0x3e8] sm:$0xff]  ;;  %v1172_v5 = vld [vmem:[%s2606_s1 + $0x400] sm:$0xff] }
 0x118   :  { %1140 = vst [vmem:[%s2607_s2 + $0x310] sm:$0xff] %v703_v1 }
 0x119   :  { %1141 = vst.msk [vmem:[%s2607_s2 + $0x318] sm:$0xff] %vm219_vm0, %v704_v2 }
 0x11a   :  { %1138 = vst [vmem:[%s2607_s2 + $0x300] sm:$0xff] %v701_v3 }
 0x11b   :  { %1139 = vst.msk [vmem:[%s2607_s2 + $0x308] sm:$0xff] %vm219_vm0, %v702_v10  ;;  %v1173_v10 = vld [vmem:[%s2606_s1 + $0x408] sm:$0xff] }
 0x11c   :  { %1142 = vst [vmem:[%s2607_s2 + $0x320] sm:$0xff] %v705_v45  ;;  %v1136_v45 = vld [vmem:[%s2606_s1 + $0x3f0] sm:$0xff] }
 0x11d   :  { %1143 = vst.msk [vmem:[%s2607_s2 + $0x328] sm:$0xff] %vm219_vm0, %v706_v36  ;;  %v643_v16 = vpop.xlane.xlu1 %642  ;;  %v641_v17 = vpop.xlane.xlu0 %640  ;;  %v1137_v36 = vld [vmem:[%s2606_s1 + $0x3f8] sm:$0xff] }
 0x11e   :  { %v709_v19 = vmul.f32 %v1114_v44, %v643_v16  ;;  %v710_v21 = vmul.f32 %v1115_v13, %v643_v16  ;;  %v707_v24 = vmul.f32 %v1112_v14, %v641_v17  ;;  %v645_v28 = vpop.xlane.xlu2 %644  ;;  %v708_v9 = vmul.f32 %v1113_v15, %v641_v17  ;;  %v1174_v14 = vld [vmem:[%s2606_s1 + $0x410] sm:$0xff] }
 0x11f   :  { %v711_v30 = vmul.f32 %v1116_v18, %v645_v28  ;;  %v712_v22 = vmul.f32 %v1117_v26, %v645_v28  ;;  %v1175_v18 = vld [vmem:[%s2606_s1 + $0x418] sm:$0xff]  ;;  %v1178_v28 = vld [vmem:[%s2606_s1 + $0x430] sm:$0xff] }
 0x120   :  { %1146 = vst [vmem:[%s2607_s2 + $0x340] sm:$0xff] %v709_v19 }
 0x121   :  { %1147 = vst.msk [vmem:[%s2607_s2 + $0x348] sm:$0xff] %vm219_vm0, %v710_v21 }
 0x122   :  { %1144 = vst [vmem:[%s2607_s2 + $0x330] sm:$0xff] %v707_v24 }
 0x123   :  { %1145 = vst.msk [vmem:[%s2607_s2 + $0x338] sm:$0xff] %vm219_vm0, %v708_v9  ;;  %v1179_v9 = vld [vmem:[%s2606_s1 + $0x438] sm:$0xff] }
 0x124   :  { %1148 = vst [vmem:[%s2607_s2 + $0x350] sm:$0xff] %v711_v30  ;;  %v1176_v30 = vld [vmem:[%s2606_s1 + $0x420] sm:$0xff] }
 0x125   :  { %1149 = vst.msk [vmem:[%s2607_s2 + $0x358] sm:$0xff] %vm219_vm0, %v712_v22  ;;  %v649_v32 = vpop.xlane.xlu1 %648  ;;  %v647_v62 = vpop.xlane.xlu0 %646  ;;  %v1177_v22 = vld [vmem:[%s2606_s1 + $0x428] sm:$0xff] }
 0x126   :  { %v715_v35 = vmul.f32 %v1120_v31, %v649_v32  ;;  %v716_v29 = vmul.f32 %v1121_v56, %v649_v32  ;;  %v713_v33 = vmul.f32 %v1118_v46, %v647_v62  ;;  %v651_v38 = vpop.xlane.xlu2 %650  ;;  %v714_v39 = vmul.f32 %v1119_v55, %v647_v62  ;;  %v1180_v46 = vld [vmem:[%s2606_s1 + $0x440] sm:$0xff] }
 0x127   :  { %v717_v40 = vmul.f32 %v1122_v23, %v651_v38  ;;  %v718_v41 = vmul.f32 %v1123_v37, %v651_v38  ;;  %v1181_v23 = vld [vmem:[%s2606_s1 + $0x448] sm:$0xff]  ;;  %v1184_v38 = vld [vmem:[%s2606_s1 + $0x460] sm:$0xff] }
 0x128   :  { %1152 = vst [vmem:[%s2607_s2 + $0x370] sm:$0xff] %v715_v35 }
 0x129   :  { %1153 = vst.msk [vmem:[%s2607_s2 + $0x378] sm:$0xff] %vm219_vm0, %v716_v29 }
 0x12a   :  { %1150 = vst [vmem:[%s2607_s2 + $0x360] sm:$0xff] %v713_v33 }
 0x12b   :  { %1151 = vst.msk [vmem:[%s2607_s2 + $0x368] sm:$0xff] %vm219_vm0, %v714_v39  ;;  %v1185_v39 = vld [vmem:[%s2606_s1 + $0x468] sm:$0xff] }
 0x12c   :  { %1154 = vst [vmem:[%s2607_s2 + $0x380] sm:$0xff] %v717_v40  ;;  %v1182_v40 = vld [vmem:[%s2606_s1 + $0x450] sm:$0xff] }
 0x12d   :  { %1155 = vst.msk [vmem:[%s2607_s2 + $0x388] sm:$0xff] %vm219_vm0, %v718_v41  ;;  %v655_v8 = vpop.xlane.xlu1 %654  ;;  %v653_v57 = vpop.xlane.xlu0 %652  ;;  %v1183_v41 = vld [vmem:[%s2606_s1 + $0x458] sm:$0xff] }
 0x12e   :  { %v721_v49 = vmul.f32 %v1126_v42, %v655_v8  ;;  %v722_v50 = vmul.f32 %v1127_v43, %v655_v8  ;;  %v719_v51 = vmul.f32 %v1124_v47, %v653_v57  ;;  %v657_v34 = vpop.xlane.xlu2 %656  ;;  %v720_v25 = vmul.f32 %v1125_v6, %v653_v57  ;;  %v1186_v47 = vld [vmem:[%s2606_s1 + $0x470] sm:$0xff] }
 0x12f   :  { %v723_v27 = vmul.f32 %v1128_v7, %v657_v34  ;;  %v724_v53 = vmul.f32 %v1129_v52, %v657_v34  ;;  %v1187_v7 = vld [vmem:[%s2606_s1 + $0x478] sm:$0xff]  ;;  %v1190_v34 = vld [vmem:[%s2606_s1 + $0x490] sm:$0xff] }
 0x130   :  { %1158 = vst [vmem:[%s2607_s2 + $0x3a0] sm:$0xff] %v721_v49 }
 0x131   :  { %1159 = vst.msk [vmem:[%s2607_s2 + $0x3a8] sm:$0xff] %vm219_vm0, %v722_v50 }
 0x132   :  { %1156 = vst [vmem:[%s2607_s2 + $0x390] sm:$0xff] %v719_v51 }
 0x133   :  { %1157 = vst.msk [vmem:[%s2607_s2 + $0x398] sm:$0xff] %vm219_vm0, %v720_v25  ;;  %v1191_v25 = vld [vmem:[%s2606_s1 + $0x498] sm:$0xff] }
 0x134   :  { %1160 = vst [vmem:[%s2607_s2 + $0x3b0] sm:$0xff] %v723_v27  ;;  %v1188_v27 = vld [vmem:[%s2606_s1 + $0x480] sm:$0xff] }
 0x135   :  { %1161 = vst.msk [vmem:[%s2607_s2 + $0x3b8] sm:$0xff] %vm219_vm0, %v724_v53  ;;  %v661_v60 = vpop.xlane.xlu1 %660  ;;  %v659_v63 = vpop.xlane.xlu0 %658  ;;  %v1189_v53 = vld [vmem:[%s2606_s1 + $0x488] sm:$0xff] }
 0x136   :  { %v727_v48 = vmul.f32 %v1132_v54, %v661_v60  ;;  %v728_v12 = vmul.f32 %v1133_v58, %v661_v60  ;;  %v725_v11 = vmul.f32 %v1130_v59, %v659_v63  ;;  %v663_v1 = vpop.xlane.xlu2 %662  ;;  %v726_v2 = vmul.f32 %v1131_v61, %v659_v63  ;;  %v1192_v59 = vld [vmem:[%s2606_s1 + $0x4a0] sm:$0xff] }
 0x137   :  { %v729_v3 = vmul.f32 %v1134_v20, %v663_v1  ;;  %v730_v4 = vmul.f32 %v1135_v0, %v663_v1  ;;  %v1193_v20 = vld [vmem:[%s2606_s1 + $0x4a8] sm:$0xff]  ;;  %v1196_v1 = vld [vmem:[%s2606_s1 + $0x4c0] sm:$0xff] }
 0x138   :  { %1164 = vst [vmem:[%s2607_s2 + $0x3d0] sm:$0xff] %v727_v48 }
 0x139   :  { %1165 = vst.msk [vmem:[%s2607_s2 + $0x3d8] sm:$0xff] %vm219_vm0, %v728_v12 }
 0x13a   :  { %1162 = vst [vmem:[%s2607_s2 + $0x3c0] sm:$0xff] %v725_v11 }
 0x13b   :  { %1163 = vst.msk [vmem:[%s2607_s2 + $0x3c8] sm:$0xff] %vm219_vm0, %v726_v2  ;;  %v1197_v2 = vld [vmem:[%s2606_s1 + $0x4c8] sm:$0xff] }
 0x13c   :  { %1166 = vst [vmem:[%s2607_s2 + $0x3e0] sm:$0xff] %v729_v3  ;;  %v1194_v3 = vld [vmem:[%s2606_s1 + $0x4b0] sm:$0xff] }
 0x13d   :  { %1167 = vst.msk [vmem:[%s2607_s2 + $0x3e8] sm:$0xff] %vm219_vm0, %v730_v4  ;;  %v807_v44 = vpop.xlane.xlu1 %806  ;;  %v665_v13 = vpop.xlane.xlu0 %664  ;;  %v1195_v4 = vld [vmem:[%s2606_s1 + $0x4b8] sm:$0xff] }
 0x13e   :  { %v873_v15 = vmul.f32 %v1172_v5, %v807_v44  ;;  %v874_v16 = vmul.f32 %v1173_v10, %v807_v44  ;;  %v731_v17 = vmul.f32 %v1136_v45, %v665_v13  ;;  %v809_v19 = vpop.xlane.xlu2 %808  ;;  %v732_v21 = vmul.f32 %v1137_v36, %v665_v13  ;;  %v1198_v45 = vld [vmem:[%s2606_s1 + $0x4d0] sm:$0xff] }
 0x13f   :  { %v875_v24 = vmul.f32 %v1174_v14, %v809_v19  ;;  %v876_v26 = vmul.f32 %v1175_v18, %v809_v19  ;;  %v1199_v14 = vld [vmem:[%s2606_s1 + $0x4d8] sm:$0xff]  ;;  %v1202_v19 = vld [vmem:[%s2606_s1 + $0x4f0] sm:$0xff] }
 0x140   :  { %1204 = vst [vmem:[%s2607_s2 + $0x400] sm:$0xff] %v873_v15 }
 0x141   :  { %1205 = vst.msk [vmem:[%s2607_s2 + $0x408] sm:$0xff] %vm219_vm0, %v874_v16 }
 0x142   :  { %1168 = vst [vmem:[%s2607_s2 + $0x3f0] sm:$0xff] %v731_v17 }
 0x143   :  { %1169 = vst.msk [vmem:[%s2607_s2 + $0x3f8] sm:$0xff] %vm219_vm0, %v732_v21  ;;  %v1203_v21 = vld [vmem:[%s2606_s1 + $0x4f8] sm:$0xff] }
 0x144   :  { %1206 = vst [vmem:[%s2607_s2 + $0x410] sm:$0xff] %v875_v24  ;;  %v1200_v24 = vld [vmem:[%s2606_s1 + $0x4e0] sm:$0xff] }
 0x145   :  { %1207 = vst.msk [vmem:[%s2607_s2 + $0x418] sm:$0xff] %vm219_vm0, %v876_v26  ;;  %v813_v31 = vpop.xlane.xlu1 %812  ;;  %v811_v56 = vpop.xlane.xlu0 %810  ;;  %v1201_v26 = vld [vmem:[%s2606_s1 + $0x4e8] sm:$0xff] }
 0x146   :  { %v879_v55 = vmul.f32 %v1178_v28, %v813_v31  ;;  %v880_v32 = vmul.f32 %v1179_v9, %v813_v31  ;;  %v877_v62 = vmul.f32 %v1176_v30, %v811_v56  ;;  %v815_v35 = vpop.xlane.xlu2 %814  ;;  %v878_v29 = vmul.f32 %v1177_v22, %v811_v56 }
 0x147   :  { %v881_v33 = vmul.f32 %v1180_v46, %v815_v35  ;;  %v882_v37 = vmul.f32 %v1181_v23, %v815_v35 }
 0x148   :  { %1210 = vst [vmem:[%s2607_s2 + $0x430] sm:$0xff] %v879_v55 }
 0x149   :  { %1211 = vst.msk [vmem:[%s2607_s2 + $0x438] sm:$0xff] %vm219_vm0, %v880_v32 }
 0x14a   :  { %1208 = vst [vmem:[%s2607_s2 + $0x420] sm:$0xff] %v877_v62 }
 0x14b   :  { %1209 = vst.msk [vmem:[%s2607_s2 + $0x428] sm:$0xff] %vm219_vm0, %v878_v29 }
 0x14c   :  { %1212 = vst [vmem:[%s2607_s2 + $0x440] sm:$0xff] %v881_v33 }
 0x14d   :  { %1213 = vst.msk [vmem:[%s2607_s2 + $0x448] sm:$0xff] %vm219_vm0, %v882_v37  ;;  %v819_v42 = vpop.xlane.xlu1 %818  ;;  %v817_v43 = vpop.xlane.xlu0 %816 }
 0x14e   :  { %v885_v6 = vmul.f32 %v1184_v38, %v819_v42  ;;  %v886_v8 = vmul.f32 %v1185_v39, %v819_v42  ;;  %v883_v57 = vmul.f32 %v1182_v40, %v817_v43  ;;  %v821_v49 = vpop.xlane.xlu2 %820  ;;  %v884_v50 = vmul.f32 %v1183_v41, %v817_v43 }
 0x14f   :  { %v887_v51 = vmul.f32 %v1186_v47, %v821_v49  ;;  %v888_v52 = vmul.f32 %v1187_v7, %v821_v49 }
 0x150   :  { %1216 = vst [vmem:[%s2607_s2 + $0x460] sm:$0xff] %v885_v6 }
 0x151   :  { %1217 = vst.msk [vmem:[%s2607_s2 + $0x468] sm:$0xff] %vm219_vm0, %v886_v8 }
 0x152   :  { %1214 = vst [vmem:[%s2607_s2 + $0x450] sm:$0xff] %v883_v57 }
 0x153   :  { %1215 = vst.msk [vmem:[%s2607_s2 + $0x458] sm:$0xff] %vm219_vm0, %v884_v50 }
 0x154   :  { %1218 = vst [vmem:[%s2607_s2 + $0x470] sm:$0xff] %v887_v51 }
 0x155   :  { %1219 = vst.msk [vmem:[%s2607_s2 + $0x478] sm:$0xff] %vm219_vm0, %v888_v52  ;;  %v825_v54 = vpop.xlane.xlu1 %824  ;;  %v823_v58 = vpop.xlane.xlu0 %822 }
 0x156   :  { %v891_v61 = vmul.f32 %v1190_v34, %v825_v54  ;;  %v892_v60 = vmul.f32 %v1191_v25, %v825_v54  ;;  %v889_v63 = vmul.f32 %v1188_v27, %v823_v58  ;;  %v827_v48 = vpop.xlane.xlu2 %826  ;;  %v890_v12 = vmul.f32 %v1189_v53, %v823_v58 }
 0x157   :  { %v893_v11 = vmul.f32 %v1192_v59, %v827_v48  ;;  %v894_v0 = vmul.f32 %v1193_v20, %v827_v48 }
 0x158   :  { %1222 = vst [vmem:[%s2607_s2 + $0x490] sm:$0xff] %v891_v61 }
 0x159   :  { %1223 = vst.msk [vmem:[%s2607_s2 + $0x498] sm:$0xff] %vm219_vm0, %v892_v60 }
 0x15a   :  { %1220 = vst [vmem:[%s2607_s2 + $0x480] sm:$0xff] %v889_v63 }
 0x15b   :  { %1221 = vst.msk [vmem:[%s2607_s2 + $0x488] sm:$0xff] %vm219_vm0, %v890_v12 }
 0x15c   :  { %1224 = vst [vmem:[%s2607_s2 + $0x4a0] sm:$0xff] %v893_v11 }
 0x15d   :  { %1225 = vst.msk [vmem:[%s2607_s2 + $0x4a8] sm:$0xff] %vm219_vm0, %v894_v0  ;;  %v831_v5 = vpop.xlane.xlu1 %830  ;;  %v829_v10 = vpop.xlane.xlu0 %828 }
 0x15e   :  { %v897_v36 = vmul.f32 %v1196_v1, %v831_v5  ;;  %v898_v44 = vmul.f32 %v1197_v2, %v831_v5  ;;  %v895_v13 = vmul.f32 %v1194_v3, %v829_v10  ;;  %v833_v15 = vpop.xlane.xlu2 %832  ;;  %v896_v16 = vmul.f32 %v1195_v4, %v829_v10 }
 0x15f   :  { %v899_v17 = vmul.f32 %v1198_v45, %v833_v15  ;;  %v900_v18 = vmul.f32 %v1199_v14, %v833_v15 }
 0x160   :  { %1228 = vst [vmem:[%s2607_s2 + $0x4c0] sm:$0xff] %v897_v36 }
 0x161   :  { %1229 = vst.msk [vmem:[%s2607_s2 + $0x4c8] sm:$0xff] %vm219_vm0, %v898_v44 }
 0x162   :  { %1226 = vst [vmem:[%s2607_s2 + $0x4b0] sm:$0xff] %v895_v13 }
 0x163   :  { %1227 = vst.msk [vmem:[%s2607_s2 + $0x4b8] sm:$0xff] %vm219_vm0, %v896_v16 }
 0x164   :  { %1230 = vst [vmem:[%s2607_s2 + $0x4d0] sm:$0xff] %v899_v17 }
 0x165   :  { %1231 = vst.msk [vmem:[%s2607_s2 + $0x4d8] sm:$0xff] %vm219_vm0, %v900_v18  ;;  %v837_v28 = vpop.xlane.xlu1 %836  ;;  %v835_v9 = vpop.xlane.xlu0 %834 }
 0x166   :  { %v903_v30 = vmul.f32 %v1202_v19, %v837_v28  ;;  %v904_v22 = vmul.f32 %v1203_v21, %v837_v28  ;;  %v901_v31 = vmul.f32 %v1200_v24, %v835_v9  ;;  %v902_v56 = vmul.f32 %v1201_v26, %v835_v9 }
 0x168   :  { %1234 = vst [vmem:[%s2607_s2 + $0x4f0] sm:$0xff] %v903_v30 }
 0x169   :  { %1235 = vst.msk [vmem:[%s2607_s2 + $0x4f8] sm:$0xff] %vm219_vm0, %v904_v22 }
 0x16a   :  { %1232 = vst [vmem:[%s2607_s2 + $0x4e0] sm:$0xff] %v901_v31 }
 0x16b   :  { %1233 = vst.msk [vmem:[%s2607_s2 + $0x4e8] sm:$0xff] %vm219_vm0, %v902_v56 }

</bundles_post_ra>
